<compile_context>
chip_gen: v7x
topology: tpu7x:2x2x1
jax: 0.10.0
libtpu: 0.0.40
codegen_flags: <defaults>
</compile_context>

<pallas_src>
import functools
import numpy as np
import jax
import jax.numpy as jnp
from jax.experimental import pallas as pl
from jax.experimental.pallas import tpu as pltpu


# ----------------------------- Pallas kernels ------------------------------
def _mm_kernel(w_ref, p_ref, b_ref, o_ref, *, relu):
    acc = jnp.dot(w_ref[...], p_ref[...], preferred_element_type=jnp.float32)
    acc = acc + b_ref[...]
    if relu:
        acc = jnp.maximum(acc, 0.0)
    o_ref[...] = acc


def matmul_pl(wm, p, bias=None, relu=False):
    """out(Cout, M) = wm(Cout, K) @ p(K, M) + bias, single-block pallas_call."""
    cout, K = wm.shape
    K2, M = p.shape
    assert K == K2
    b2 = (jnp.zeros((cout,), jnp.float32) if bias is None else bias)
    b2 = b2.reshape(cout, 1).astype(jnp.float32)
    return pl.pallas_call(
        functools.partial(_mm_kernel, relu=relu),
        out_shape=jax.ShapeDtypeStruct((cout, M), jnp.float32),
        grid=(1,),
        in_specs=[
            pl.BlockSpec((cout, K), lambda i: (0, 0)),
            pl.BlockSpec((K, M), lambda i: (0, 0)),
            pl.BlockSpec((cout, 1), lambda i: (0, 0)),
        ],
        out_specs=pl.BlockSpec((cout, M), lambda i: (0, 0)),
    )(wm, p, b2)


def _mm_bscale_kernel(w_ref, p_ref, b_ref, s_ref, o_ref, *, seg):
    acc = jnp.dot(w_ref[...], p_ref[...], preferred_element_type=jnp.float32)
    acc = acc + b_ref[...]
    s = s_ref[...]
    for i in range(s_ref.shape[1]):              # static loop over batch
        o_ref[:, i * seg:(i + 1) * seg] = acc[:, i * seg:(i + 1) * seg] * s[:, i:i + 1]


def matmul_bscale_pl(wm, p, scale, seg, bias=None):
    """Matmul with a per-(row, batch-segment) scale (e.g. mask_G) fused in the
    epilogue. Columns [i*seg, (i+1)*seg) belong to batch i; scale is (Cout, nbatch)."""
    cout, K = wm.shape
    _, M = p.shape
    nseg = scale.shape[1]
    b2 = (jnp.zeros((cout,), jnp.float32) if bias is None else bias)
    b2 = b2.reshape(cout, 1).astype(jnp.float32)
    return pl.pallas_call(
        functools.partial(_mm_bscale_kernel, seg=seg),
        out_shape=jax.ShapeDtypeStruct((cout, M), jnp.float32),
        grid=(1,),
        in_specs=[
            pl.BlockSpec((cout, K), lambda i: (0, 0)),
            pl.BlockSpec((K, M), lambda i: (0, 0)),
            pl.BlockSpec((cout, 1), lambda i: (0, 0)),
            pl.BlockSpec((cout, nseg), lambda i: (0, 0)),
        ],
        out_specs=pl.BlockSpec((cout, M), lambda i: (0, 0)),
    )(wm, p, b2, scale.astype(jnp.float32))


def _mm_addscaled_kernel(w_ref, p_ref, b_ref, add_ref, s_ref, o_ref):
    acc = jnp.dot(w_ref[...], p_ref[...], preferred_element_type=jnp.float32)
    o_ref[...] = acc + b_ref[...] + s_ref[0] * add_ref[...]


def matmul_addscaled_pl(wm, p, bias, add, scale):
    """out = wm @ p + bias + scale*add  (traced scalar `scale` passed via SMEM)."""
    cout, K = wm.shape
    _, M = p.shape
    b2 = bias.reshape(cout, 1).astype(jnp.float32)
    s1 = jnp.asarray(scale, dtype=jnp.float32).reshape((1,))
    return pl.pallas_call(
        _mm_addscaled_kernel,
        out_shape=jax.ShapeDtypeStruct((cout, M), jnp.float32),
        grid=(1,),
        in_specs=[
            pl.BlockSpec((cout, K), lambda i: (0, 0)),
            pl.BlockSpec((K, M), lambda i: (0, 0)),
            pl.BlockSpec((cout, 1), lambda i: (0, 0)),
            pl.BlockSpec((cout, M), lambda i: (0, 0)),
            pl.BlockSpec(memory_space=pltpu.MemorySpace.SMEM),
        ],
        out_specs=pl.BlockSpec((cout, M), lambda i: (0, 0)),
    )(wm, p, b2, add.astype(jnp.float32), s1)


def _skipconv_kernel(p_ref, w_ref, b_ref, cs_ref, w1_ref, b1_ref, w2_ref, b2_ref,
                     o_ref, *, seg):
    # 3x3 body conv on the MXU:  y = W @ P + b   -> (Cout, b*H*W)
    y = jnp.dot(w_ref[...], p_ref[...], preferred_element_type=jnp.float32)
    y = y + b_ref[...]
    # scale branch: two 1x1 convs on cs_ratio (2, nbatch), done on the VPU
    # with broadcasts -- free filler under the MXU matmul.
    cs = cs_ref[...]                              # (2, nbatch)  f32
    w1 = w1_ref[...]                              # (C, 2)
    s = w1[:, 0:1] * cs[0:1, :] + w1[:, 1:2] * cs[1:2, :] + b1_ref[...]
    s = jnp.maximum(s, 0.0)                       # (C, nbatch)
    w2 = w2_ref[...]                              # (C, C)
    s2 = jnp.zeros_like(s) + b2_ref[...]
    for ci in range(w2_ref.shape[0]):
        s2 = s2 + w2[:, ci:ci + 1] * s[ci:ci + 1, :]
    # per-(batch, channel) scale applied in the epilogue; batch i occupies the
    # lane range [i*seg, (i+1)*seg).
    for i in range(cs_ref.shape[1]):
        o_ref[:, i * seg:(i + 1) * seg] = y[:, i * seg:(i + 1) * seg] * s2[:, i:i + 1]


def _dct2_kernel(z_ref, l_ref, r_ref, o_ref):
    # o[b] = L @ z[b] @ R, both matmuls fused in one kernel (static batch loop).
    left = l_ref[...]
    right = r_ref[...]
    for i in range(z_ref.shape[0]):
        t = jnp.dot(left, z_ref[i], preferred_element_type=jnp.float32)
        o_ref[i] = jnp.dot(t, right, preferred_element_type=jnp.float32)


def dct2_pl(z_bhw, left, right):
    bsz, h, w = z_bhw.shape
    return pl.pallas_call(
        _dct2_kernel,
        out_shape=jax.ShapeDtypeStruct((bsz, h, w), jnp.float32),
        grid=(1,),
        in_specs=[
            pl.BlockSpec((bsz, h, w), lambda i: (0, 0, 0)),
            pl.BlockSpec((h, h), lambda i: (0, 0)),
            pl.BlockSpec((w, w), lambda i: (0, 0)),
        ],
        out_specs=pl.BlockSpec((bsz, h, w), lambda i: (0, 0, 0)),
    )(z_bhw.astype(jnp.float32), left, right)


# ------------------------------ conv wrappers -------------------------------
def _im2col_c(x_c, kh, kw, stride, pad):
    """CNHW (C, b, H, W) -> patches (C*kh*kw, b*Ho*Wo) in bf16 (MXU operands)."""
    C, bsz, H, W = x_c.shape
    x_c = x_c.astype(jnp.bfloat16)
    xp = jnp.pad(x_c, ((0, 0), (0, 0), (pad, pad), (pad, pad)))
    Ho = (H + 2 * pad - kh) // stride + 1
    Wo = (W + 2 * pad - kw) // stride + 1
    shifts = [xp[:, :, i:i + stride * Ho:stride, j:j + stride * Wo:stride]
              for i in range(kh) for j in range(kw)]
    p = jnp.stack(shifts, axis=1)                 # (C, kh*kw, b, Ho, Wo)
    return p.reshape(C * kh * kw, bsz * Ho * Wo), Ho, Wo


def conv2d_c(x_c, w, bias, stride=1, pad=0, relu=False):
    """Conv on a CNHW activation; returns CNHW (Cout, b, Ho, Wo)."""
    cout, cin, kh, kw = w.shape
    p, Ho, Wo = _im2col_c(x_c, kh, kw, stride, pad)
    wm = w.reshape(cout, cin * kh * kw).astype(jnp.bfloat16)
    out = matmul_pl(wm, p, bias, relu=relu)       # (cout, b*Ho*Wo)
    return out.reshape(cout, x_c.shape[1], Ho, Wo)


def skip_conv(scp, x_c, cs_T):
    """Fused SkipConv: scale(cs_ratio) * conv3x3(x) in ONE pallas_call."""
    C, bsz, H, W = x_c.shape
    p, _, _ = _im2col_c(x_c, 3, 3, 1, 1)          # (C*9, b*H*W) bf16
    wm = scp['body_w'].reshape(C, C * 9).astype(jnp.bfloat16)
    seg = H * W
    M = bsz * seg
    out = pl.pallas_call(
        functools.partial(_skipconv_kernel, seg=seg),
        out_shape=jax.ShapeDtypeStruct((C, M), jnp.float32),
        grid=(1,),
        in_specs=[
            pl.BlockSpec((C * 9, M), lambda i: (0, 0)),
            pl.BlockSpec((C, C * 9), lambda i: (0, 0)),
            pl.BlockSpec((C, 1), lambda i: (0, 0)),
            pl.BlockSpec((2, bsz), lambda i: (0, 0)),
            pl.BlockSpec((C, 2), lambda i: (0, 0)),
            pl.BlockSpec((C, 1), lambda i: (0, 0)),
            pl.BlockSpec((C, C), lambda i: (0, 0)),
            pl.BlockSpec((C, 1), lambda i: (0, 0)),
        ],
        out_specs=pl.BlockSpec((C, M), lambda i: (0, 0)),
    )(p, wm,
      scp['body_b'].reshape(C, 1).astype(jnp.float32),
      cs_T.astype(jnp.float32),
      scp['sc1_w'].reshape(C, 2).astype(jnp.float32),
      scp['sc1_b'].reshape(C, 1).astype(jnp.float32),
      scp['sc2_w'].reshape(C, C).astype(jnp.float32),
      scp['sc2_b'].reshape(C, 1).astype(jnp.float32))
    return out.reshape(C, bsz, H, W)


# ------------------------------ small helpers ------------------------------
def pixel_shuffle(x, r):
    b, c, h, w = x.shape
    co = c // (r * r)
    x = x.reshape(b, co, r, r, h, w).transpose(0, 1, 4, 2, 5, 3)
    return x.reshape(b, co, h * r, w * r)


def pixel_unshuffle(x, r):
    b, c, h, w = x.shape
    ho, wo = h // r, w // r
    x = x.reshape(b, c, ho, r, wo, r).transpose(0, 1, 3, 5, 2, 4)
    return x.reshape(b, c * r * r, ho, wo)


def _dct_matrix(m):
    # torch-dct (norm=None) DCT-II matrix: D[k, i] = 2*cos(pi*(2i+1)*k / (2m))
    k = np.arange(m)[:, None]
    i = np.arange(m)[None, :]
    return (2.0 * np.cos(np.pi * (2 * i + 1) * k / (2 * m))).astype(np.float32)


def _zigzag_indices(h, w):
    # TODO(synk): get_zigzag_truncated_indices is not provided in the reference;
    # standard JPEG zig-zag traversal of the full (h, w) grid is used.
    xs, ys = [], []
    for s in range(h + w - 1):
        if s % 2 == 0:
            r, c = min(s, h - 1), s - min(s, h - 1)
            while r >= 0 and c < w:
                xs.append(r); ys.append(c); r -= 1; c += 1
        else:
            c, r = min(s, w - 1), s - min(s, w - 1)
            while c >= 0 and r < h:
                xs.append(r); ys.append(c); r += 1; c -= 1
    return np.array(xs, np.int32), np.array(ys, np.int32)


# ------------------------------- SS / Stage --------------------------------
def ss_forward(ssp, x_c, cs_T):
    # x_c: (1, b, h, w) CNHW
    h_ = conv2d_c(x_c, ssp['head_w'], ssp['head_b'], pad=1)
    for sc in ssp['body']:
        h_ = skip_conv(sc, h_, cs_T)
    return conv2d_c(h_, ssp['tail_w'], ssp['tail_b'], pad=1)      # (2, b, h, w)


def ss_fuse(ssp, x_c, s_par, cs_T):
    # x_c: (4, b, H, W) CNHW
    C, bsz, H, W = x_c.shape
    x1_c = x_c[2:3]                                               # (1, b, H, W)
    # fused: x2 = s[0]*x + head(x1)   (s[0]*x folded into the conv epilogue)
    p, _, _ = _im2col_c(x1_c, 3, 3, 1, 1)
    wm = ssp['head_w'].reshape(-1, 9).astype(jnp.bfloat16)        # (nf4, 9)
    x2 = matmul_addscaled_pl(wm, p, ssp['head_b'],
                             x_c.reshape(C, bsz * H * W), s_par[0])
    x2 = x2.reshape(C, bsz, H, W)
    for sc in ssp['body']:
        x2 = skip_conv(sc, x2, cs_T)
    x3 = conv2d_c(x2, ssp['tail_w'], ssp['tail_b'], pad=1)        # (2, b, H, W)
    return x3, s_par[1] * x2


def stage_forward(stp, ssp, x, y, cs_T, A_op, AT_op):
    # x: NCHW (b, nf, 8, 8)
    xs = pixel_shuffle(x, 2)                                      # (b, 4, 16, 16)
    x_c = xs.transpose(1, 0, 2, 3)                                # (4, b, 16, 16)
    z = xs[:, :2]
    z1_c, H_c = ss_fuse(ssp, x_c, stp['s'], cs_T)                 # (2,b,h,w), (4,b,h,w)
    Az1 = A_op(z1_c)
    diff = [Az1[0] - y[0], Az1[1] - y[1]]
    z = z - stp['rho'] * AT_op(diff)                              # NCHW (b,2,h,w)
    xcat = H_c.transpose(1, 0, 2, 3) + jnp.concatenate([z, xs[:, 2:]], axis=1)
    xu = pixel_unshuffle(xcat, 2)                                 # (b, 16, 8, 8)
    xu_c = xu.transpose(1, 0, 2, 3)
    bx = conv2d_c(xu_c, stp['c1_w'], stp['c1_b'], pad=1)
    # TODO(synk): RB -> ConvTransBlock definition not provided in the reference; treated as identity.
    bx = conv2d_c(bx, stp['c2_w'], stp['c2_b'], pad=1)
    return xu + bx.transpose(1, 0, 2, 3)


# --------------------------------- Net --------------------------------------
def net_forward(params, x, q_G, q_DCT, key, *, B):
    bsz, c, h, w = x.shape
    N = B * B
    n = h * w
    h_B, w_B = h // B, w // B
    hwB = h_B * w_B
    ssp = params['SS']

    # cs_ratio in transposed layout (2, b): row 0 = G, row 1 = DCT
    cs_T = (jnp.stack([q_G, q_DCT], axis=0) / N).astype(jnp.float32)

    k1, k2 = jax.random.split(key)
    perm = jax.random.permutation(k1, n)
    perm_inv = jnp.zeros((n,), jnp.int32).at[perm].set(jnp.arange(n, dtype=jnp.int32))
    W_G = params['A_weight_G'][jax.random.permutation(k2, N)].reshape(N, B * B)

    mask_G_T = (jnp.arange(N)[:, None] < q_G[None, :]).astype(jnp.float32)     # (N, b)
    zz_x, zz_y = _zigzag_indices(h, w)
    flat_zz = jnp.asarray(zz_x * w + zz_y, dtype=jnp.int32)
    mask_DCT_flat = (jnp.arange(n)[None, :] // hwB < q_DCT[:, None]).astype(jnp.float32)

    Dh_np, Dw_np = _dct_matrix(h), _dct_matrix(w)
    Dh = jnp.asarray(Dh_np)
    DwT = jnp.asarray(Dw_np.T)
    Dh_inv = jnp.asarray(np.linalg.inv(Dh_np.astype(np.float64)).astype(np.float32))
    Dw_invT = jnp.asarray(np.linalg.inv(Dw_np.astype(np.float64)).astype(np.float32).T)

    # Gaussian measurement operator (mask_G fused in-kernel; measurement
    # tensors stay in the transposed (N, b*h_B*w_B) kernel layout end-to-end).
    def A_G(z_bhw):                               # (b, h, w) -> (N, b*h_B*w_B)
        zf = jnp.take(z_bhw.reshape(bsz, n), perm, axis=1)
        blocks = zf.reshape(bsz, h_B, B, w_B, B).transpose(2, 4, 0, 1, 3)
        blocks = blocks.reshape(B * B, bsz * hwB)
        return matmul_bscale_pl(W_G, blocks, mask_G_T, seg=hwB)

    def AT_G(d):                                  # (N, b*h_B*w_B) -> (b, 1, h, w)
        pix = matmul_pl(W_G.T, d, None)           # (B*B, b*h_B*w_B)
        img = pix.reshape(B, B, bsz, h_B, w_B).transpose(2, 3, 0, 4, 1).reshape(bsz, n)
        img = jnp.take(img, perm_inv, axis=1)
        return img.reshape(bsz, 1, h, w)

    # DCT measurement operator (fused 2-D DCT kernel; zig-zag gather + mask in XLA,
    # measurement tensors kept as zig-zag-ordered (b, n) vectors).
    def A_DCT(z_bhw):                             # (b, h, w) -> (b, n)
        Y = dct2_pl(z_bhw, Dh, DwT).reshape(bsz, n)
        return jnp.take(Y, flat_zz, axis=1) * mask_DCT_flat

    def AT_DCT(d):                                # (b, n) -> (b, 1, h, w)
        buf = jnp.zeros((bsz, n), jnp.float32).at[:, flat_zz].set(d)
        return dct2_pl(buf.reshape(bsz, h, w), Dh_inv, Dw_invT).reshape(bsz, 1, h, w)

    def A_op(z_c):                                # z_c: CNHW (2, b, h, w)
        return [A_G(z_c[0]), A_DCT(z_c[1])]

    def AT_op(d):
        return jnp.concatenate([AT_G(d[0]), AT_DCT(d[1])], axis=1)   # (b, 2, h, w)

    # y = A(SS(x))
    ss_out = ss_forward(ssp, x.transpose(1, 0, 2, 3), cs_T)       # (2, b, h, w)
    y = A_op(ss_out)

    # head: Conv2d(2, nf, 6, padding=2, stride=2) on AT(y)
    aty = AT_op(y)                                                # (b, 2, h, w)
    xh_c = conv2d_c(aty.transpose(1, 0, 2, 3), params['head_w'], params['head_b'],
                    stride=2, pad=2)                              # (nf, b, 8, 8)
    xh = xh_c.transpose(1, 0, 2, 3)                               # (b, nf, 8, 8)

    for stp in params['stages']:
        xh = stage_forward(stp, ssp, xh, y, cs_T, A_op, AT_op)

    out_c = conv2d_c(xh.transpose(1, 0, 2, 3), params['tail_w'], params['tail_b'],
                     pad=1)                                       # (4, b, 8, 8)
    return pixel_shuffle(out_c.transpose(1, 0, 2, 3), 2)          # (b, 1, h, w)


# ------------------------------ parameter init ------------------------------
def init_params(key, nb, B, nf):
    N = B * B
    keys = iter(jax.random.split(key, 256))

    def conv_p(cout, cin, kh, kw):
        k1, k2 = next(keys), next(keys)
        bound = 1.0 / np.sqrt(cin * kh * kw)
        w = jax.random.uniform(k1, (cout, cin, kh, kw), jnp.float32, -bound, bound)
        bb = jax.random.uniform(k2, (cout,), jnp.float32, -bound, bound)
        return w, bb

    nf4 = nf // 4
    ss = {}
    ss['head_w'], ss['head_b'] = conv_p(nf4, 1, 3, 3)
    ss['body'] = []
    for _ in range(5):
        sc = {}
        sc['body_w'], sc['body_b'] = conv_p(nf4, nf4, 3, 3)
        sc['sc1_w'], sc['sc1_b'] = conv_p(nf4, 2, 1, 1)
        sc['sc2_w'], sc['sc2_b'] = conv_p(nf4, nf4, 1, 1)
        ss['body'].append(sc)
    ss['tail_w'], ss['tail_b'] = conv_p(2, nf4, 3, 3)

    # A_weight_G = (U @ Vh of SVD(randn(N, N))).reshape(N, 1, B, B)
    g = np.asarray(jax.random.normal(next(keys), (N, N), jnp.float32), dtype=np.float64)
    u, _, vh = np.linalg.svd(g)
    A_weight_G = jnp.asarray((u @ vh).reshape(N, 1, B, B), dtype=jnp.float32)

    head_w, head_b = conv_p(nf, 2, 6, 6)

    stages = []
    for _ in range(nb):
        st = {'rho': jnp.array([1.0], jnp.float32),
              's': jnp.array([0.5, 0.5], jnp.float32)}
        st['c1_w'], st['c1_b'] = conv_p(nf, nf, 3, 3)
        st['c2_w'], st['c2_b'] = conv_p(nf, nf, 3, 3)
        stages.append(st)

    tail_w, tail_b = conv_p(4, nf, 3, 3)

    return {'SS': ss, 'A_weight_G': A_weight_G,
            'head_w': head_w, 'head_b': head_b,
            'stages': stages, 'tail_w': tail_w, 'tail_b': tail_b}


# ---------------------------------- main -------------------------------------
if __name__ == "__main__":
    nb, B, nf = 2, 4, 16          # N = B*B = 16, nf // 4 = 4
    b, h, w = 2, 16, 16

    root = jax.random.PRNGKey(0)
    kp, kx, kq = jax.random.split(root, 3)

    params = init_params(kp, nb, B, nf)
    x = jax.random.normal(kx, (b, 1, h, w), jnp.float32)
    q_G = jnp.array([8.0, 12.0], jnp.float32)
    q_DCT = jnp.array([10.0, 6.0], jnp.float32)

    fwd = jax.jit(functools.partial(net_forward, B=B))
    out = fwd(params, x, q_G, q_DCT, kq)
    out = jax.block_until_ready(out)

    assert out.shape == (b, 1, h, w), out.shape
    assert bool(jnp.all(jnp.isfinite(out)))
    print("KERNEL_OK")
</pallas_src>

<mosaic_0001>
module attributes {stable_mosaic.version = 11 : i64} {
  func.func @_mm_kernel(%arg0: i32, %arg1: memref<4x9xbf16, #tpu.memory_space<vmem>>, %arg2: memref<9x512xbf16, #tpu.memory_space<vmem>>, %arg3: memref<4x1xf32, #tpu.memory_space<vmem>>, %arg4: memref<4x512xf32, #tpu.memory_space<vmem>>) attributes {dimension_semantics = [#tpu.dimension_semantics<arbitrary>], iteration_bounds = array<i64: 1>, scalar_prefetch = 0 : i64, scratch_operands = 0 : i64, tpu.core_type = #tpu.core_type<tc>, window_params = [{pipeline_mode = #tpu.pipeline_mode<synchronous>, transform_indices = @transform_0, window_bounds = array<i64: 4, 9>}, {pipeline_mode = #tpu.pipeline_mode<synchronous>, transform_indices = @transform_1, window_bounds = array<i64: 9, 512>}, {pipeline_mode = #tpu.pipeline_mode<synchronous>, transform_indices = @transform_2, window_bounds = array<i64: 4, 1>}, {pipeline_mode = #tpu.pipeline_mode<synchronous>, transform_indices = @transform_3, window_bounds = array<i64: 4, 512>}]} {
    %c0 = arith.constant 0 : index
    %c0_0 = arith.constant 0 : index
    %0 = vector.load %arg1[%c0, %c0_0] : memref<4x9xbf16, #tpu.memory_space<vmem>>, vector<4x9xbf16>
    %c0_1 = arith.constant 0 : index
    %c0_2 = arith.constant 0 : index
    %1 = vector.load %arg2[%c0_1, %c0_2] : memref<9x512xbf16, #tpu.memory_space<vmem>>, vector<9x512xbf16>
    %cst = arith.constant dense<0.000000e+00> : vector<4x512xf32>
    %2 = tpu.matmul %0, %1, %cst {dimension_numbers = #tpu.dot_dimension_numbers<[1], [0], [0], [1], [0, 0, 1, 1], [], []>} : vector<4x9xbf16>, vector<9x512xbf16>, vector<4x512xf32> -> vector<4x512xf32>
    %c0_3 = arith.constant 0 : index
    %c0_4 = arith.constant 0 : index
    %3 = vector.load %arg3[%c0_3, %c0_4] : memref<4x1xf32, #tpu.memory_space<vmem>>, vector<4x1xf32>
    %4 = vector.broadcast %3 : vector<4x1xf32> to vector<4x512xf32>
    %5 = arith.addf %2, %4 : vector<4x512xf32>
    %c0_5 = arith.constant 0 : index
    %c0_6 = arith.constant 0 : index
    %6 = vector.load %arg4[%c0_5, %c0_6] : memref<4x512xf32, #tpu.memory_space<vmem>>, vector<4x512xf32>
    tpu.vector_store %arg4[%c0_5, %c0_6], %5 {strides = array<i32>} : memref<4x512xf32, #tpu.memory_space<vmem>>, vector<4x512xf32>,
    return
  }
  func.func @transform_0(%arg0: i32) -> (i32, i32) {
    %c0_i32 = arith.constant 0 : i32
    %c0_i32_0 = arith.constant 0 : i32
    %c0_i32_1 = arith.constant 0 : i32
    return %c0_i32, %c0_i32_0 : i32, i32
  }
  func.func @transform_1(%arg0: i32) -> (i32, i32) {
    %c0_i32 = arith.constant 0 : i32
    %c0_i32_0 = arith.constant 0 : i32
    %c0_i32_1 = arith.constant 0 : i32
    return %c0_i32, %c0_i32_0 : i32, i32
  }
  func.func @transform_2(%arg0: i32) -> (i32, i32) {
    %c0_i32 = arith.constant 0 : i32
    %c0_i32_0 = arith.constant 0 : i32
    %c0_i32_1 = arith.constant 0 : i32
    return %c0_i32, %c0_i32_0 : i32, i32
  }
  func.func @transform_3(%arg0: i32) -> (i32, i32) {
    %c0_i32 = arith.constant 0 : i32
    %c0_i32_0 = arith.constant 0 : i32
    %c0_i32_1 = arith.constant 0 : i32
    return %c0_i32, %c0_i32_0 : i32, i32
  }
}

module attributes {stable_mosaic.version = 11 : i64} {
  func.func @_skipconv_kernel(%arg0: i32, %arg1: memref<36x512xbf16, #tpu.memory_space<vmem>>, %arg2: memref<4x36xbf16, #tpu.memory_space<vmem>>, %arg3: memref<4x1xf32, #tpu.memory_space<vmem>>, %arg4: memref<2x2xf32, #tpu.memory_space<vmem>>, %arg5: memref<4x2xf32, #tpu.memory_space<vmem>>, %arg6: memref<4x1xf32, #tpu.memory_space<vmem>>, %arg7: memref<4x4xf32, #tpu.memory_space<vmem>>, %arg8: memref<4x1xf32, #tpu.memory_space<vmem>>, %arg9: memref<4x512xf32, #tpu.memory_space<vmem>>) attributes {dimension_semantics = [#tpu.dimension_semantics<arbitrary>], iteration_bounds = array<i64: 1>, scalar_prefetch = 0 : i64, scratch_operands = 0 : i64, tpu.core_type = #tpu.core_type<tc>, window_params = [{pipeline_mode = #tpu.pipeline_mode<synchronous>, transform_indices = @transform_0, window_bounds = array<i64: 36, 512>}, {pipeline_mode = #tpu.pipeline_mode<synchronous>, transform_indices = @transform_1, window_bounds = array<i64: 4, 36>}, {pipeline_mode = #tpu.pipeline_mode<synchronous>, transform_indices = @transform_2, window_bounds = array<i64: 4, 1>}, {pipeline_mode = #tpu.pipeline_mode<synchronous>, transform_indices = @transform_3, window_bounds = array<i64: 2, 2>}, {pipeline_mode = #tpu.pipeline_mode<synchronous>, transform_indices = @transform_4, window_bounds = array<i64: 4, 2>}, {pipeline_mode = #tpu.pipeline_mode<synchronous>, transform_indices = @transform_5, window_bounds = array<i64: 4, 1>}, {pipeline_mode = #tpu.pipeline_mode<synchronous>, transform_indices = @transform_6, window_bounds = array<i64: 4, 4>}, {pipeline_mode = #tpu.pipeline_mode<synchronous>, transform_indices = @transform_7, window_bounds = array<i64: 4, 1>}, {pipeline_mode = #tpu.pipeline_mode<synchronous>, transform_indices = @transform_8, window_bounds = array<i64: 4, 512>}]} {
    %c0 = arith.constant 0 : index
    %c0_0 = arith.constant 0 : index
    %0 = vector.load %arg2[%c0, %c0_0] : memref<4x36xbf16, #tpu.memory_space<vmem>>, vector<4x36xbf16>
    %c0_1 = arith.constant 0 : index
    %c0_2 = arith.constant 0 : index
    %1 = vector.load %arg1[%c0_1, %c0_2] : memref<36x512xbf16, #tpu.memory_space<vmem>>, vector<36x512xbf16>
    %cst = arith.constant dense<0.000000e+00> : vector<4x512xf32>
    %2 = tpu.matmul %0, %1, %cst {dimension_numbers = #tpu.dot_dimension_numbers<[1], [0], [0], [1], [0, 0, 1, 1], [], []>} : vector<4x36xbf16>, vector<36x512xbf16>, vector<4x512xf32> -> vector<4x512xf32>
    %c0_3 = arith.constant 0 : index
    %c0_4 = arith.constant 0 : index
    %3 = vector.load %arg3[%c0_3, %c0_4] : memref<4x1xf32, #tpu.memory_space<vmem>>, vector<4x1xf32>
    %4 = vector.broadcast %3 : vector<4x1xf32> to vector<4x512xf32>
    %5 = arith.addf %2, %4 : vector<4x512xf32>
    %c0_5 = arith.constant 0 : index
    %c0_6 = arith.constant 0 : index
    %6 = vector.load %arg4[%c0_5, %c0_6] : memref<2x2xf32, #tpu.memory_space<vmem>>, vector<2x2xf32>
    %c0_7 = arith.constant 0 : index
    %c0_8 = arith.constant 0 : index
    %7 = vector.load %arg5[%c0_7, %c0_8] : memref<4x2xf32, #tpu.memory_space<vmem>>, vector<4x2xf32>
    %8 = vector.extract_strided_slice %7 {offsets = [0, 0], sizes = [4, 1], strides = [1, 1]} : vector<4x2xf32> to vector<4x1xf32>
    %9 = vector.extract_strided_slice %6 {offsets = [0, 0], sizes = [1, 2], strides = [1, 1]} : vector<2x2xf32> to vector<1x2xf32>
    %10 = vector.broadcast %8 : vector<4x1xf32> to vector<4x2xf32>
    %11 = vector.broadcast %9 : vector<1x2xf32> to vector<4x2xf32>
    %12 = arith.mulf %10, %11 : vector<4x2xf32>
    %13 = vector.extract_strided_slice %7 {offsets = [0, 1], sizes = [4, 1], strides = [1, 1]} : vector<4x2xf32> to vector<4x1xf32>
    %14 = vector.extract_strided_slice %6 {offsets = [1, 0], sizes = [1, 2], strides = [1, 1]} : vector<2x2xf32> to vector<1x2xf32>
    %15 = vector.broadcast %13 : vector<4x1xf32> to vector<4x2xf32>
    %16 = vector.broadcast %14 : vector<1x2xf32> to vector<4x2xf32>
    %17 = arith.mulf %15, %16 : vector<4x2xf32>
    %18 = arith.addf %12, %17 : vector<4x2xf32>
    %c0_9 = arith.constant 0 : index
    %c0_10 = arith.constant 0 : index
    %19 = vector.load %arg6[%c0_9, %c0_10] : memref<4x1xf32, #tpu.memory_space<vmem>>, vector<4x1xf32>
    %20 = vector.broadcast %19 : vector<4x1xf32> to vector<4x2xf32>
    %21 = arith.addf %18, %20 : vector<4x2xf32>
    %cst_11 = arith.constant 0.000000e+00 : f32
    %22 = vector.broadcast %cst_11 : f32 to vector<4x2xf32>
    %23 = arith.maximumf %21, %22 : vector<4x2xf32>
    %c0_12 = arith.constant 0 : index
    %c0_13 = arith.constant 0 : index
    %24 = vector.load %arg7[%c0_12, %c0_13] : memref<4x4xf32, #tpu.memory_space<vmem>>, vector<4x4xf32>
    %cst_14 = arith.constant 0.000000e+00 : f32
    %25 = vector.broadcast %cst_14 : f32 to vector<4x2xf32>
    %c0_15 = arith.constant 0 : index
    %c0_16 = arith.constant 0 : index
    %26 = vector.load %arg8[%c0_15, %c0_16] : memref<4x1xf32, #tpu.memory_space<vmem>>, vector<4x1xf32>
    %27 = vector.broadcast %26 : vector<4x1xf32> to vector<4x2xf32>
    %28 = arith.addf %25, %27 : vector<4x2xf32>
    %29 = vector.extract_strided_slice %24 {offsets = [0, 0], sizes = [4, 1], strides = [1, 1]} : vector<4x4xf32> to vector<4x1xf32>
    %30 = vector.extract_strided_slice %23 {offsets = [0, 0], sizes = [1, 2], strides = [1, 1]} : vector<4x2xf32> to vector<1x2xf32>
    %31 = vector.broadcast %29 : vector<4x1xf32> to vector<4x2xf32>
    %32 = vector.broadcast %30 : vector<1x2xf32> to vector<4x2xf32>
    %33 = arith.mulf %31, %32 : vector<4x2xf32>
    %34 = arith.addf %28, %33 : vector<4x2xf32>
    %35 = vector.extract_strided_slice %24 {offsets = [0, 1], sizes = [4, 1], strides = [1, 1]} : vector<4x4xf32> to vector<4x1xf32>
    %36 = vector.extract_strided_slice %23 {offsets = [1, 0], sizes = [1, 2], strides = [1, 1]} : vector<4x2xf32> to vector<1x2xf32>
    %37 = vector.broadcast %35 : vector<4x1xf32> to vector<4x2xf32>
    %38 = vector.broadcast %36 : vector<1x2xf32> to vector<4x2xf32>
    %39 = arith.mulf %37, %38 : vector<4x2xf32>
    %40 = arith.addf %34, %39 : vector<4x2xf32>
    %41 = vector.extract_strided_slice %24 {offsets = [0, 2], sizes = [4, 1], strides = [1, 1]} : vector<4x4xf32> to vector<4x1xf32>
    %42 = vector.extract_strided_slice %23 {offsets = [2, 0], sizes = [1, 2], strides = [1, 1]} : vector<4x2xf32> to vector<1x2xf32>
    %43 = vector.broadcast %41 : vector<4x1xf32> to vector<4x2xf32>
    %44 = vector.broadcast %42 : vector<1x2xf32> to vector<4x2xf32>
    %45 = arith.mulf %43, %44 : vector<4x2xf32>
    %46 = arith.addf %40, %45 : vector<4x2xf32>
    %47 = vector.extract_strided_slice %24 {offsets = [0, 3], sizes = [4, 1], strides = [1, 1]} : vector<4x4xf32> to vector<4x1xf32>
    %48 = vector.extract_strided_slice %23 {offsets = [3, 0], sizes = [1, 2], strides = [1, 1]} : vector<4x2xf32> to vector<1x2xf32>
    %49 = vector.broadcast %47 : vector<4x1xf32> to vector<4x2xf32>
    %50 = vector.broadcast %48 : vector<1x2xf32> to vector<4x2xf32>
    %51 = arith.mulf %49, %50 : vector<4x2xf32>
    %52 = arith.addf %46, %51 : vector<4x2xf32>
    %53 = vector.extract_strided_slice %5 {offsets = [0, 0], sizes = [4, 256], strides = [1, 1]} : vector<4x512xf32> to vector<4x256xf32>
    %54 = vector.extract_strided_slice %52 {offsets = [0, 0], sizes = [4, 1], strides = [1, 1]} : vector<4x2xf32> to vector<4x1xf32>
    %55 = vector.broadcast %54 : vector<4x1xf32> to vector<4x256xf32>
    %56 = arith.mulf %53, %55 : vector<4x256xf32>
    %c0_17 = arith.constant 0 : index
    %c0_18 = arith.constant 0 : index
    %57 = vector.load %arg9[%c0_17, %c0_18] : memref<4x512xf32, #tpu.memory_space<vmem>>, vector<4x256xf32>
    tpu.vector_store %arg9[%c0_17, %c0_18], %56 {strides = array<i32>} : memref<4x512xf32, #tpu.memory_space<vmem>>, vector<4x256xf32>,
    %58 = vector.extract_strided_slice %5 {offsets = [0, 256], sizes = [4, 256], strides = [1, 1]} : vector<4x512xf32> to vector<4x256xf32>
    %59 = vector.extract_strided_slice %52 {offsets = [0, 1], sizes = [4, 1], strides = [1, 1]} : vector<4x2xf32> to vector<4x1xf32>
    %60 = vector.broadcast %59 : vector<4x1xf32> to vector<4x256xf32>
    %61 = arith.mulf %58, %60 : vector<4x256xf32>
    %c0_19 = arith.constant 0 : index
    %c256 = arith.constant 256 : index
    %62 = vector.load %arg9[%c0_19, %c256] : memref<4x512xf32, #tpu.memory_space<vmem>>, vector<4x256xf32>
    tpu.vector_store %arg9[%c0_19, %c256], %61 {strides = array<i32>} : memref<4x512xf32, #tpu.memory_space<vmem>>, vector<4x256xf32>,
    return
  }
  func.func @transform_0(%arg0: i32) -> (i32, i32) {
    %c0_i32 = arith.constant 0 : i32
    %c0_i32_0 = arith.constant 0 : i32
    %c0_i32_1 = arith.constant 0 : i32
    return %c0_i32, %c0_i32_0 : i32, i32
  }
  func.func @transform_1(%arg0: i32) -> (i32, i32) {
    %c0_i32 = arith.constant 0 : i32
    %c0_i32_0 = arith.constant 0 : i32
    %c0_i32_1 = arith.constant 0 : i32
    return %c0_i32, %c0_i32_0 : i32, i32
  }
  func.func @transform_2(%arg0: i32) -> (i32, i32) {
    %c0_i32 = arith.constant 0 : i32
    %c0_i32_0 = arith.constant 0 : i32
    %c0_i32_1 = arith.constant 0 : i32
    return %c0_i32, %c0_i32_0 : i32, i32
  }
  func.func @transform_3(%arg0: i32) -> (i32, i32) {
    %c0_i32 = arith.constant 0 : i32
    %c0_i32_0 = arith.constant 0 : i32
    %c0_i32_1 = arith.constant 0 : i32
    return %c0_i32, %c0_i32_0 : i32, i32
  }
  func.func @transform_4(%arg0: i32) -> (i32, i32) {
    %c0_i32 = arith.constant 0 : i32
    %c0_i32_0 = arith.constant 0 : i32
    %c0_i32_1 = arith.constant 0 : i32
    return %c0_i32, %c0_i32_0 : i32, i32
  }
  func.func @transform_5(%arg0: i32) -> (i32, i32) {
    %c0_i32 = arith.constant 0 : i32
    %c0_i32_0 = arith.constant 0 : i32
    %c0_i32_1 = arith.constant 0 : i32
    return %c0_i32, %c0_i32_0 : i32, i32
  }
  func.func @transform_6(%arg0: i32) -> (i32, i32) {
    %c0_i32 = arith.constant 0 : i32
    %c0_i32_0 = arith.constant 0 : i32
    %c0_i32_1 = arith.constant 0 : i32
    return %c0_i32, %c0_i32_0 : i32, i32
  }
  func.func @transform_7(%arg0: i32) -> (i32, i32) {
    %c0_i32 = arith.constant 0 : i32
    %c0_i32_0 = arith.constant 0 : i32
    %c0_i32_1 = arith.constant 0 : i32
    return %c0_i32, %c0_i32_0 : i32, i32
  }
  func.func @transform_8(%arg0: i32) -> (i32, i32) {
    %c0_i32 = arith.constant 0 : i32
    %c0_i32_0 = arith.constant 0 : i32
    %c0_i32_1 = arith.constant 0 : i32
    return %c0_i32, %c0_i32_0 : i32, i32
  }
}

module attributes {stable_mosaic.version = 11 : i64} {
  func.func @_mm_kernel(%arg0: i32, %arg1: memref<2x36xbf16, #tpu.memory_space<vmem>>, %arg2: memref<36x512xbf16, #tpu.memory_space<vmem>>, %arg3: memref<2x1xf32, #tpu.memory_space<vmem>>, %arg4: memref<2x512xf32, #tpu.memory_space<vmem>>) attributes {dimension_semantics = [#tpu.dimension_semantics<arbitrary>], iteration_bounds = array<i64: 1>, scalar_prefetch = 0 : i64, scratch_operands = 0 : i64, tpu.core_type = #tpu.core_type<tc>, window_params = [{pipeline_mode = #tpu.pipeline_mode<synchronous>, transform_indices = @transform_0, window_bounds = array<i64: 2, 36>}, {pipeline_mode = #tpu.pipeline_mode<synchronous>, transform_indices = @transform_1, window_bounds = array<i64: 36, 512>}, {pipeline_mode = #tpu.pipeline_mode<synchronous>, transform_indices = @transform_2, window_bounds = array<i64: 2, 1>}, {pipeline_mode = #tpu.pipeline_mode<synchronous>, transform_indices = @transform_3, window_bounds = array<i64: 2, 512>}]} {
    %c0 = arith.constant 0 : index
    %c0_0 = arith.constant 0 : index
    %0 = vector.load %arg1[%c0, %c0_0] : memref<2x36xbf16, #tpu.memory_space<vmem>>, vector<2x36xbf16>
    %c0_1 = arith.constant 0 : index
    %c0_2 = arith.constant 0 : index
    %1 = vector.load %arg2[%c0_1, %c0_2] : memref<36x512xbf16, #tpu.memory_space<vmem>>, vector<36x512xbf16>
    %cst = arith.constant dense<0.000000e+00> : vector<2x512xf32>
    %2 = tpu.matmul %0, %1, %cst {dimension_numbers = #tpu.dot_dimension_numbers<[1], [0], [0], [1], [0, 0, 1, 1], [], []>} : vector<2x36xbf16>, vector<36x512xbf16>, vector<2x512xf32> -> vector<2x512xf32>
    %c0_3 = arith.constant 0 : index
    %c0_4 = arith.constant 0 : index
    %3 = vector.load %arg3[%c0_3, %c0_4] : memref<2x1xf32, #tpu.memory_space<vmem>>, vector<2x1xf32>
    %4 = vector.broadcast %3 : vector<2x1xf32> to vector<2x512xf32>
    %5 = arith.addf %2, %4 : vector<2x512xf32>
    %c0_5 = arith.constant 0 : index
    %c0_6 = arith.constant 0 : index
    %6 = vector.load %arg4[%c0_5, %c0_6] : memref<2x512xf32, #tpu.memory_space<vmem>>, vector<2x512xf32>
    tpu.vector_store %arg4[%c0_5, %c0_6], %5 {strides = array<i32>} : memref<2x512xf32, #tpu.memory_space<vmem>>, vector<2x512xf32>,
    return
  }
  func.func @transform_0(%arg0: i32) -> (i32, i32) {
    %c0_i32 = arith.constant 0 : i32
    %c0_i32_0 = arith.constant 0 : i32
    %c0_i32_1 = arith.constant 0 : i32
    return %c0_i32, %c0_i32_0 : i32, i32
  }
  func.func @transform_1(%arg0: i32) -> (i32, i32) {
    %c0_i32 = arith.constant 0 : i32
    %c0_i32_0 = arith.constant 0 : i32
    %c0_i32_1 = arith.constant 0 : i32
    return %c0_i32, %c0_i32_0 : i32, i32
  }
  func.func @transform_2(%arg0: i32) -> (i32, i32) {
    %c0_i32 = arith.constant 0 : i32
    %c0_i32_0 = arith.constant 0 : i32
    %c0_i32_1 = arith.constant 0 : i32
    return %c0_i32, %c0_i32_0 : i32, i32
  }
  func.func @transform_3(%arg0: i32) -> (i32, i32) {
    %c0_i32 = arith.constant 0 : i32
    %c0_i32_0 = arith.constant 0 : i32
    %c0_i32_1 = arith.constant 0 : i32
    return %c0_i32, %c0_i32_0 : i32, i32
  }
}

module attributes {stable_mosaic.version = 11 : i64} {
  func.func @_mm_kernel(%arg0: i32, %arg1: memref<16x16xf32, #tpu.memory_space<vmem>>, %arg2: memref<16x32xf32, #tpu.memory_space<vmem>>, %arg3: memref<16x1xf32, #tpu.memory_space<vmem>>, %arg4: memref<16x32xf32, #tpu.memory_space<vmem>>) attributes {dimension_semantics = [#tpu.dimension_semantics<arbitrary>], iteration_bounds = array<i64: 1>, scalar_prefetch = 0 : i64, scratch_operands = 0 : i64, tpu.core_type = #tpu.core_type<tc>, window_params = [{pipeline_mode = #tpu.pipeline_mode<synchronous>, transform_indices = @transform_0, window_bounds = array<i64: 16, 16>}, {pipeline_mode = #tpu.pipeline_mode<synchronous>, transform_indices = @transform_1, window_bounds = array<i64: 16, 32>}, {pipeline_mode = #tpu.pipeline_mode<synchronous>, transform_indices = @transform_2, window_bounds = array<i64: 16, 1>}, {pipeline_mode = #tpu.pipeline_mode<synchronous>, transform_indices = @transform_3, window_bounds = array<i64: 16, 32>}]} {
    %c0 = arith.constant 0 : index
    %c0_0 = arith.constant 0 : index
    %0 = vector.load %arg1[%c0, %c0_0] : memref<16x16xf32, #tpu.memory_space<vmem>>, vector<16x16xf32>
    %c0_1 = arith.constant 0 : index
    %c0_2 = arith.constant 0 : index
    %1 = vector.load %arg2[%c0_1, %c0_2] : memref<16x32xf32, #tpu.memory_space<vmem>>, vector<16x32xf32>
    %cst = arith.constant dense<0.000000e+00> : vector<16x32xf32>
    %2 = tpu.matmul %0, %1, %cst {dimension_numbers = #tpu.dot_dimension_numbers<[1], [0], [0], [1], [0, 0, 1, 1], [], []>} : vector<16x16xf32>, vector<16x32xf32>, vector<16x32xf32> -> vector<16x32xf32>
    %c0_3 = arith.constant 0 : index
    %c0_4 = arith.constant 0 : index
    %3 = vector.load %arg3[%c0_3, %c0_4] : memref<16x1xf32, #tpu.memory_space<vmem>>, vector<16x1xf32>
    %4 = vector.broadcast %3 : vector<16x1xf32> to vector<16x32xf32>
    %5 = arith.addf %2, %4 : vector<16x32xf32>
    %c0_5 = arith.constant 0 : index
    %c0_6 = arith.constant 0 : index
    %6 = vector.load %arg4[%c0_5, %c0_6] : memref<16x32xf32, #tpu.memory_space<vmem>>, vector<16x32xf32>
    tpu.vector_store %arg4[%c0_5, %c0_6], %5 {strides = array<i32>} : memref<16x32xf32, #tpu.memory_space<vmem>>, vector<16x32xf32>,
    return
  }
  func.func @transform_0(%arg0: i32) -> (i32, i32) {
    %c0_i32 = arith.constant 0 : i32
    %c0_i32_0 = arith.constant 0 : i32
    %c0_i32_1 = arith.constant 0 : i32
    return %c0_i32, %c0_i32_0 : i32, i32
  }
  func.func @transform_1(%arg0: i32) -> (i32, i32) {
    %c0_i32 = arith.constant 0 : i32
    %c0_i32_0 = arith.constant 0 : i32
    %c0_i32_1 = arith.constant 0 : i32
    return %c0_i32, %c0_i32_0 : i32, i32
  }
  func.func @transform_2(%arg0: i32) -> (i32, i32) {
    %c0_i32 = arith.constant 0 : i32
    %c0_i32_0 = arith.constant 0 : i32
    %c0_i32_1 = arith.constant 0 : i32
    return %c0_i32, %c0_i32_0 : i32, i32
  }
  func.func @transform_3(%arg0: i32) -> (i32, i32) {
    %c0_i32 = arith.constant 0 : i32
    %c0_i32_0 = arith.constant 0 : i32
    %c0_i32_1 = arith.constant 0 : i32
    return %c0_i32, %c0_i32_0 : i32, i32
  }
}

module attributes {stable_mosaic.version = 11 : i64} {
  func.func @_mm_bscale_kernel(%arg0: i32, %arg1: memref<16x16xf32, #tpu.memory_space<vmem>>, %arg2: memref<16x32xf32, #tpu.memory_space<vmem>>, %arg3: memref<16x1xf32, #tpu.memory_space<vmem>>, %arg4: memref<16x2xf32, #tpu.memory_space<vmem>>, %arg5: memref<16x32xf32, #tpu.memory_space<vmem>>) attributes {dimension_semantics = [#tpu.dimension_semantics<arbitrary>], iteration_bounds = array<i64: 1>, scalar_prefetch = 0 : i64, scratch_operands = 0 : i64, tpu.core_type = #tpu.core_type<tc>, window_params = [{pipeline_mode = #tpu.pipeline_mode<synchronous>, transform_indices = @transform_0, window_bounds = array<i64: 16, 16>}, {pipeline_mode = #tpu.pipeline_mode<synchronous>, transform_indices = @transform_1, window_bounds = array<i64: 16, 32>}, {pipeline_mode = #tpu.pipeline_mode<synchronous>, transform_indices = @transform_2, window_bounds = array<i64: 16, 1>}, {pipeline_mode = #tpu.pipeline_mode<synchronous>, transform_indices = @transform_3, window_bounds = array<i64: 16, 2>}, {pipeline_mode = #tpu.pipeline_mode<synchronous>, transform_indices = @transform_4, window_bounds = array<i64: 16, 32>}]} {
    %c0 = arith.constant 0 : index
    %c0_0 = arith.constant 0 : index
    %0 = vector.load %arg1[%c0, %c0_0] : memref<16x16xf32, #tpu.memory_space<vmem>>, vector<16x16xf32>
    %c0_1 = arith.constant 0 : index
    %c0_2 = arith.constant 0 : index
    %1 = vector.load %arg2[%c0_1, %c0_2] : memref<16x32xf32, #tpu.memory_space<vmem>>, vector<16x32xf32>
    %cst = arith.constant dense<0.000000e+00> : vector<16x32xf32>
    %2 = tpu.matmul %0, %1, %cst {dimension_numbers = #tpu.dot_dimension_numbers<[1], [0], [0], [1], [0, 0, 1, 1], [], []>} : vector<16x16xf32>, vector<16x32xf32>, vector<16x32xf32> -> vector<16x32xf32>
    %c0_3 = arith.constant 0 : index
    %c0_4 = arith.constant 0 : index
    %3 = vector.load %arg3[%c0_3, %c0_4] : memref<16x1xf32, #tpu.memory_space<vmem>>, vector<16x1xf32>
    %4 = vector.broadcast %3 : vector<16x1xf32> to vector<16x32xf32>
    %5 = arith.addf %2, %4 : vector<16x32xf32>
    %c0_5 = arith.constant 0 : index
    %c0_6 = arith.constant 0 : index
    %6 = vector.load %arg4[%c0_5, %c0_6] : memref<16x2xf32, #tpu.memory_space<vmem>>, vector<16x2xf32>
    %7 = vector.extract_strided_slice %5 {offsets = [0, 0], sizes = [16, 16], strides = [1, 1]} : vector<16x32xf32> to vector<16x16xf32>
    %8 = vector.extract_strided_slice %6 {offsets = [0, 0], sizes = [16, 1], strides = [1, 1]} : vector<16x2xf32> to vector<16x1xf32>
    %9 = vector.broadcast %8 : vector<16x1xf32> to vector<16x16xf32>
    %10 = arith.mulf %7, %9 : vector<16x16xf32>
    %c0_7 = arith.constant 0 : index
    %c0_8 = arith.constant 0 : index
    %11 = vector.load %arg5[%c0_7, %c0_8] : memref<16x32xf32, #tpu.memory_space<vmem>>, vector<16x16xf32>
    tpu.vector_store %arg5[%c0_7, %c0_8], %10 {strides = array<i32>} : memref<16x32xf32, #tpu.memory_space<vmem>>, vector<16x16xf32>,
    %12 = vector.extract_strided_slice %5 {offsets = [0, 16], sizes = [16, 16], strides = [1, 1]} : vector<16x32xf32> to vector<16x16xf32>
    %13 = vector.extract_strided_slice %6 {offsets = [0, 1], sizes = [16, 1], strides = [1, 1]} : vector<16x2xf32> to vector<16x1xf32>
    %14 = vector.broadcast %13 : vector<16x1xf32> to vector<16x16xf32>
    %15 = arith.mulf %12, %14 : vector<16x16xf32>
    %c0_9 = arith.constant 0 : index
    %c16 = arith.constant 16 : index
    %16 = vector.load %arg5[%c0_9, %c16] : memref<16x32xf32, #tpu.memory_space<vmem>>, vector<16x16xf32>
    tpu.vector_store %arg5[%c0_9, %c16], %15 {strides = array<i32>} : memref<16x32xf32, #tpu.memory_space<vmem>>, vector<16x16xf32>,
    return
  }
  func.func @transform_0(%arg0: i32) -> (i32, i32) {
    %c0_i32 = arith.constant 0 : i32
    %c0_i32_0 = arith.constant 0 : i32
    %c0_i32_1 = arith.constant 0 : i32
    return %c0_i32, %c0_i32_0 : i32, i32
  }
  func.func @transform_1(%arg0: i32) -> (i32, i32) {
    %c0_i32 = arith.constant 0 : i32
    %c0_i32_0 = arith.constant 0 : i32
    %c0_i32_1 = arith.constant 0 : i32
    return %c0_i32, %c0_i32_0 : i32, i32
  }
  func.func @transform_2(%arg0: i32) -> (i32, i32) {
    %c0_i32 = arith.constant 0 : i32
    %c0_i32_0 = arith.constant 0 : i32
    %c0_i32_1 = arith.constant 0 : i32
    return %c0_i32, %c0_i32_0 : i32, i32
  }
  func.func @transform_3(%arg0: i32) -> (i32, i32) {
    %c0_i32 = arith.constant 0 : i32
    %c0_i32_0 = arith.constant 0 : i32
    %c0_i32_1 = arith.constant 0 : i32
    return %c0_i32, %c0_i32_0 : i32, i32
  }
  func.func @transform_4(%arg0: i32) -> (i32, i32) {
    %c0_i32 = arith.constant 0 : i32
    %c0_i32_0 = arith.constant 0 : i32
    %c0_i32_1 = arith.constant 0 : i32
    return %c0_i32, %c0_i32_0 : i32, i32
  }
}

module attributes {stable_mosaic.version = 11 : i64} {
  func.func @_dct2_kernel(%arg0: i32, %arg1: memref<2x16x16xf32, #tpu.memory_space<vmem>>, %arg2: memref<16x16xf32, #tpu.memory_space<vmem>>, %arg3: memref<16x16xf32, #tpu.memory_space<vmem>>, %arg4: memref<2x16x16xf32, #tpu.memory_space<vmem>>) attributes {dimension_semantics = [#tpu.dimension_semantics<arbitrary>], iteration_bounds = array<i64: 1>, scalar_prefetch = 0 : i64, scratch_operands = 0 : i64, tpu.core_type = #tpu.core_type<tc>, window_params = [{pipeline_mode = #tpu.pipeline_mode<synchronous>, transform_indices = @transform_0, window_bounds = array<i64: 2, 16, 16>}, {pipeline_mode = #tpu.pipeline_mode<synchronous>, transform_indices = @transform_1, window_bounds = array<i64: 16, 16>}, {pipeline_mode = #tpu.pipeline_mode<synchronous>, transform_indices = @transform_2, window_bounds = array<i64: 16, 16>}, {pipeline_mode = #tpu.pipeline_mode<synchronous>, transform_indices = @transform_3, window_bounds = array<i64: 2, 16, 16>}]} {
    %c0 = arith.constant 0 : index
    %c0_0 = arith.constant 0 : index
    %0 = vector.load %arg2[%c0, %c0_0] : memref<16x16xf32, #tpu.memory_space<vmem>>, vector<16x16xf32>
    %c0_1 = arith.constant 0 : index
    %c0_2 = arith.constant 0 : index
    %1 = vector.load %arg3[%c0_1, %c0_2] : memref<16x16xf32, #tpu.memory_space<vmem>>, vector<16x16xf32>
    %c0_3 = arith.constant 0 : index
    %c0_4 = arith.constant 0 : index
    %c0_5 = arith.constant 0 : index
    %2 = vector.load %arg1[%c0_3, %c0_4, %c0_5] : memref<2x16x16xf32, #tpu.memory_space<vmem>>, vector<1x16x16xf32>
    %3 = vector.shape_cast %2 : vector<1x16x16xf32> to vector<16x16xf32>
    %cst = arith.constant dense<0.000000e+00> : vector<16x16xf32>
    %4 = tpu.matmul %0, %3, %cst {dimension_numbers = #tpu.dot_dimension_numbers<[1], [0], [0], [1], [0, 0, 1, 1], [], []>} : vector<16x16xf32>, vector<16x16xf32>, vector<16x16xf32> -> vector<16x16xf32>
    %cst_6 = arith.constant dense<0.000000e+00> : vector<16x16xf32>
    %5 = tpu.matmul %4, %1, %cst_6 {dimension_numbers = #tpu.dot_dimension_numbers<[1], [0], [0], [1], [0, 0, 1, 1], [], []>} : vector<16x16xf32>, vector<16x16xf32>, vector<16x16xf32> -> vector<16x16xf32>
    %c0_7 = arith.constant 0 : index
    %c0_8 = arith.constant 0 : index
    %c0_9 = arith.constant 0 : index
    %6 = vector.load %arg4[%c0_7, %c0_8, %c0_9] : memref<2x16x16xf32, #tpu.memory_space<vmem>>, vector<1x16x16xf32>
    %7 = vector.shape_cast %6 : vector<1x16x16xf32> to vector<16x16xf32>
    %8 = vector.shape_cast %5 : vector<16x16xf32> to vector<1x16x16xf32>
    tpu.vector_store %arg4[%c0_7, %c0_8, %c0_9], %8 {strides = array<i32>} : memref<2x16x16xf32, #tpu.memory_space<vmem>>, vector<1x16x16xf32>,
    %c1 = arith.constant 1 : index
    %c0_10 = arith.constant 0 : index
    %c0_11 = arith.constant 0 : index
    %9 = vector.load %arg1[%c1, %c0_10, %c0_11] : memref<2x16x16xf32, #tpu.memory_space<vmem>>, vector<1x16x16xf32>
    %10 = vector.shape_cast %9 : vector<1x16x16xf32> to vector<16x16xf32>
    %cst_12 = arith.constant dense<0.000000e+00> : vector<16x16xf32>
    %11 = tpu.matmul %0, %10, %cst_12 {dimension_numbers = #tpu.dot_dimension_numbers<[1], [0], [0], [1], [0, 0, 1, 1], [], []>} : vector<16x16xf32>, vector<16x16xf32>, vector<16x16xf32> -> vector<16x16xf32>
    %cst_13 = arith.constant dense<0.000000e+00> : vector<16x16xf32>
    %12 = tpu.matmul %11, %1, %cst_13 {dimension_numbers = #tpu.dot_dimension_numbers<[1], [0], [0], [1], [0, 0, 1, 1], [], []>} : vector<16x16xf32>, vector<16x16xf32>, vector<16x16xf32> -> vector<16x16xf32>
    %c1_14 = arith.constant 1 : index
    %c0_15 = arith.constant 0 : index
    %c0_16 = arith.constant 0 : index
    %13 = vector.load %arg4[%c1_14, %c0_15, %c0_16] : memref<2x16x16xf32, #tpu.memory_space<vmem>>, vector<1x16x16xf32>
    %14 = vector.shape_cast %13 : vector<1x16x16xf32> to vector<16x16xf32>
    %15 = vector.shape_cast %12 : vector<16x16xf32> to vector<1x16x16xf32>
    tpu.vector_store %arg4[%c1_14, %c0_15, %c0_16], %15 {strides = array<i32>} : memref<2x16x16xf32, #tpu.memory_space<vmem>>, vector<1x16x16xf32>,
    return
  }
  func.func @transform_0(%arg0: i32) -> (i32, i32, i32) {
    %c0_i32 = arith.constant 0 : i32
    %c0_i32_0 = arith.constant 0 : i32
    %c0_i32_1 = arith.constant 0 : i32
    %c0_i32_2 = arith.constant 0 : i32
    return %c0_i32, %c0_i32_0, %c0_i32_1 : i32, i32, i32
  }
  func.func @transform_1(%arg0: i32) -> (i32, i32) {
    %c0_i32 = arith.constant 0 : i32
    %c0_i32_0 = arith.constant 0 : i32
    %c0_i32_1 = arith.constant 0 : i32
    return %c0_i32, %c0_i32_0 : i32, i32
  }
  func.func @transform_2(%arg0: i32) -> (i32, i32) {
    %c0_i32 = arith.constant 0 : i32
    %c0_i32_0 = arith.constant 0 : i32
    %c0_i32_1 = arith.constant 0 : i32
    return %c0_i32, %c0_i32_0 : i32, i32
  }
  func.func @transform_3(%arg0: i32) -> (i32, i32, i32) {
    %c0_i32 = arith.constant 0 : i32
    %c0_i32_0 = arith.constant 0 : i32
    %c0_i32_1 = arith.constant 0 : i32
    %c0_i32_2 = arith.constant 0 : i32
    return %c0_i32, %c0_i32_0, %c0_i32_1 : i32, i32, i32
  }
}

module attributes {stable_mosaic.version = 11 : i64} {
  func.func @_mm_kernel(%arg0: i32, %arg1: memref<16x72xbf16, #tpu.memory_space<vmem>>, %arg2: memref<72x128xbf16, #tpu.memory_space<vmem>>, %arg3: memref<16x1xf32, #tpu.memory_space<vmem>>, %arg4: memref<16x128xf32, #tpu.memory_space<vmem>>) attributes {dimension_semantics = [#tpu.dimension_semantics<arbitrary>], iteration_bounds = array<i64: 1>, scalar_prefetch = 0 : i64, scratch_operands = 0 : i64, tpu.core_type = #tpu.core_type<tc>, window_params = [{pipeline_mode = #tpu.pipeline_mode<synchronous>, transform_indices = @transform_0, window_bounds = array<i64: 16, 72>}, {pipeline_mode = #tpu.pipeline_mode<synchronous>, transform_indices = @transform_1, window_bounds = array<i64: 72, 128>}, {pipeline_mode = #tpu.pipeline_mode<synchronous>, transform_indices = @transform_2, window_bounds = array<i64: 16, 1>}, {pipeline_mode = #tpu.pipeline_mode<synchronous>, transform_indices = @transform_3, window_bounds = array<i64: 16, 128>}]} {
    %c0 = arith.constant 0 : index
    %c0_0 = arith.constant 0 : index
    %0 = vector.load %arg1[%c0, %c0_0] : memref<16x72xbf16, #tpu.memory_space<vmem>>, vector<16x72xbf16>
    %c0_1 = arith.constant 0 : index
    %c0_2 = arith.constant 0 : index
    %1 = vector.load %arg2[%c0_1, %c0_2] : memref<72x128xbf16, #tpu.memory_space<vmem>>, vector<72x128xbf16>
    %cst = arith.constant dense<0.000000e+00> : vector<16x128xf32>
    %2 = tpu.matmul %0, %1, %cst {dimension_numbers = #tpu.dot_dimension_numbers<[1], [0], [0], [1], [0, 0, 1, 1], [], []>} : vector<16x72xbf16>, vector<72x128xbf16>, vector<16x128xf32> -> vector<16x128xf32>
    %c0_3 = arith.constant 0 : index
    %c0_4 = arith.constant 0 : index
    %3 = vector.load %arg3[%c0_3, %c0_4] : memref<16x1xf32, #tpu.memory_space<vmem>>, vector<16x1xf32>
    %4 = vector.broadcast %3 : vector<16x1xf32> to vector<16x128xf32>
    %5 = arith.addf %2, %4 : vector<16x128xf32>
    %c0_5 = arith.constant 0 : index
    %c0_6 = arith.constant 0 : index
    %6 = vector.load %arg4[%c0_5, %c0_6] : memref<16x128xf32, #tpu.memory_space<vmem>>, vector<16x128xf32>
    tpu.vector_store %arg4[%c0_5, %c0_6], %5 {strides = array<i32>} : memref<16x128xf32, #tpu.memory_space<vmem>>, vector<16x128xf32>,
    return
  }
  func.func @transform_0(%arg0: i32) -> (i32, i32) {
    %c0_i32 = arith.constant 0 : i32
    %c0_i32_0 = arith.constant 0 : i32
    %c0_i32_1 = arith.constant 0 : i32
    return %c0_i32, %c0_i32_0 : i32, i32
  }
  func.func @transform_1(%arg0: i32) -> (i32, i32) {
    %c0_i32 = arith.constant 0 : i32
    %c0_i32_0 = arith.constant 0 : i32
    %c0_i32_1 = arith.constant 0 : i32
    return %c0_i32, %c0_i32_0 : i32, i32
  }
  func.func @transform_2(%arg0: i32) -> (i32, i32) {
    %c0_i32 = arith.constant 0 : i32
    %c0_i32_0 = arith.constant 0 : i32
    %c0_i32_1 = arith.constant 0 : i32
    return %c0_i32, %c0_i32_0 : i32, i32
  }
  func.func @transform_3(%arg0: i32) -> (i32, i32) {
    %c0_i32 = arith.constant 0 : i32
    %c0_i32_0 = arith.constant 0 : i32
    %c0_i32_1 = arith.constant 0 : i32
    return %c0_i32, %c0_i32_0 : i32, i32
  }
}

module attributes {stable_mosaic.version = 11 : i64} {
  func.func @_mm_addscaled_kernel(%arg0: i32, %arg1: memref<4x9xbf16, #tpu.memory_space<vmem>>, %arg2: memref<9x512xbf16, #tpu.memory_space<vmem>>, %arg3: memref<4x1xf32, #tpu.memory_space<vmem>>, %arg4: memref<4x512xf32, #tpu.memory_space<vmem>>, %arg5: memref<1xf32, #tpu.memory_space<smem>>, %arg6: memref<4x512xf32, #tpu.memory_space<vmem>>) attributes {dimension_semantics = [#tpu.dimension_semantics<arbitrary>], iteration_bounds = array<i64: 1>, scalar_prefetch = 0 : i64, scratch_operands = 0 : i64, tpu.core_type = #tpu.core_type<tc>, window_params = [{pipeline_mode = #tpu.pipeline_mode<synchronous>, transform_indices = @transform_0, window_bounds = array<i64: 4, 9>}, {pipeline_mode = #tpu.pipeline_mode<synchronous>, transform_indices = @transform_1, window_bounds = array<i64: 9, 512>}, {pipeline_mode = #tpu.pipeline_mode<synchronous>, transform_indices = @transform_2, window_bounds = array<i64: 4, 1>}, {pipeline_mode = #tpu.pipeline_mode<synchronous>, transform_indices = @transform_3, window_bounds = array<i64: 4, 512>}, {transform_indices = @transform_4, window_bounds = array<i64: 1>}, {pipeline_mode = #tpu.pipeline_mode<synchronous>, transform_indices = @transform_5, window_bounds = array<i64: 4, 512>}]} {
    %c0 = arith.constant 0 : index
    %c0_0 = arith.constant 0 : index
    %0 = vector.load %arg1[%c0, %c0_0] : memref<4x9xbf16, #tpu.memory_space<vmem>>, vector<4x9xbf16>
    %c0_1 = arith.constant 0 : index
    %c0_2 = arith.constant 0 : index
    %1 = vector.load %arg2[%c0_1, %c0_2] : memref<9x512xbf16, #tpu.memory_space<vmem>>, vector<9x512xbf16>
    %cst = arith.constant dense<0.000000e+00> : vector<4x512xf32>
    %2 = tpu.matmul %0, %1, %cst {dimension_numbers = #tpu.dot_dimension_numbers<[1], [0], [0], [1], [0, 0, 1, 1], [], []>} : vector<4x9xbf16>, vector<9x512xbf16>, vector<4x512xf32> -> vector<4x512xf32>
    %c0_3 = arith.constant 0 : index
    %c0_4 = arith.constant 0 : index
    %3 = vector.load %arg3[%c0_3, %c0_4] : memref<4x1xf32, #tpu.memory_space<vmem>>, vector<4x1xf32>
    %4 = vector.broadcast %3 : vector<4x1xf32> to vector<4x512xf32>
    %5 = arith.addf %2, %4 : vector<4x512xf32>
    %c0_5 = arith.constant 0 : index
    %6 = memref.load %arg5[%c0_5] : memref<1xf32, #tpu.memory_space<smem>>
    %c0_6 = arith.constant 0 : index
    %c0_7 = arith.constant 0 : index
    %7 = vector.load %arg4[%c0_6, %c0_7] : memref<4x512xf32, #tpu.memory_space<vmem>>, vector<4x512xf32>
    %8 = vector.broadcast %6 : f32 to vector<4x512xf32>
    %9 = arith.mulf %8, %7 : vector<4x512xf32>
    %10 = arith.addf %5, %9 : vector<4x512xf32>
    %c0_8 = arith.constant 0 : index
    %c0_9 = arith.constant 0 : index
    %11 = vector.load %arg6[%c0_8, %c0_9] : memref<4x512xf32, #tpu.memory_space<vmem>>, vector<4x512xf32>
    tpu.vector_store %arg6[%c0_8, %c0_9], %10 {strides = array<i32>} : memref<4x512xf32, #tpu.memory_space<vmem>>, vector<4x512xf32>,
    return
  }
  func.func @transform_0(%arg0: i32) -> (i32, i32) {
    %c0_i32 = arith.constant 0 : i32
    %c0_i32_0 = arith.constant 0 : i32
    %c0_i32_1 = arith.constant 0 : i32
    return %c0_i32, %c0_i32_0 : i32, i32
  }
  func.func @transform_1(%arg0: i32) -> (i32, i32) {
    %c0_i32 = arith.constant 0 : i32
    %c0_i32_0 = arith.constant 0 : i32
    %c0_i32_1 = arith.constant 0 : i32
    return %c0_i32, %c0_i32_0 : i32, i32
  }
  func.func @transform_2(%arg0: i32) -> (i32, i32) {
    %c0_i32 = arith.constant 0 : i32
    %c0_i32_0 = arith.constant 0 : i32
    %c0_i32_1 = arith.constant 0 : i32
    return %c0_i32, %c0_i32_0 : i32, i32
  }
  func.func @transform_3(%arg0: i32) -> (i32, i32) {
    %c0_i32 = arith.constant 0 : i32
    %c0_i32_0 = arith.constant 0 : i32
    %c0_i32_1 = arith.constant 0 : i32
    return %c0_i32, %c0_i32_0 : i32, i32
  }
  func.func @transform_4(%arg0: i32) -> i32 {
    %c0_i32 = arith.constant 0 : i32
    %c0_i32_0 = arith.constant 0 : i32
    return %c0_i32 : i32
  }
  func.func @transform_5(%arg0: i32) -> (i32, i32) {
    %c0_i32 = arith.constant 0 : i32
    %c0_i32_0 = arith.constant 0 : i32
    %c0_i32_1 = arith.constant 0 : i32
    return %c0_i32, %c0_i32_0 : i32, i32
  }
}

module attributes {stable_mosaic.version = 11 : i64} {
  func.func @_mm_kernel(%arg0: i32, %arg1: memref<16x144xbf16, #tpu.memory_space<vmem>>, %arg2: memref<144x128xbf16, #tpu.memory_space<vmem>>, %arg3: memref<16x1xf32, #tpu.memory_space<vmem>>, %arg4: memref<16x128xf32, #tpu.memory_space<vmem>>) attributes {dimension_semantics = [#tpu.dimension_semantics<arbitrary>], iteration_bounds = array<i64: 1>, scalar_prefetch = 0 : i64, scratch_operands = 0 : i64, tpu.core_type = #tpu.core_type<tc>, window_params = [{pipeline_mode = #tpu.pipeline_mode<synchronous>, transform_indices = @transform_0, window_bounds = array<i64: 16, 144>}, {pipeline_mode = #tpu.pipeline_mode<synchronous>, transform_indices = @transform_1, window_bounds = array<i64: 144, 128>}, {pipeline_mode = #tpu.pipeline_mode<synchronous>, transform_indices = @transform_2, window_bounds = array<i64: 16, 1>}, {pipeline_mode = #tpu.pipeline_mode<synchronous>, transform_indices = @transform_3, window_bounds = array<i64: 16, 128>}]} {
    %c0 = arith.constant 0 : index
    %c0_0 = arith.constant 0 : index
    %0 = vector.load %arg1[%c0, %c0_0] : memref<16x144xbf16, #tpu.memory_space<vmem>>, vector<16x144xbf16>
    %c0_1 = arith.constant 0 : index
    %c0_2 = arith.constant 0 : index
    %1 = vector.load %arg2[%c0_1, %c0_2] : memref<144x128xbf16, #tpu.memory_space<vmem>>, vector<144x128xbf16>
    %cst = arith.constant dense<0.000000e+00> : vector<16x128xf32>
    %2 = tpu.matmul %0, %1, %cst {dimension_numbers = #tpu.dot_dimension_numbers<[1], [0], [0], [1], [0, 0, 1, 1], [], []>} : vector<16x144xbf16>, vector<144x128xbf16>, vector<16x128xf32> -> vector<16x128xf32>
    %c0_3 = arith.constant 0 : index
    %c0_4 = arith.constant 0 : index
    %3 = vector.load %arg3[%c0_3, %c0_4] : memref<16x1xf32, #tpu.memory_space<vmem>>, vector<16x1xf32>
    %4 = vector.broadcast %3 : vector<16x1xf32> to vector<16x128xf32>
    %5 = arith.addf %2, %4 : vector<16x128xf32>
    %c0_5 = arith.constant 0 : index
    %c0_6 = arith.constant 0 : index
    %6 = vector.load %arg4[%c0_5, %c0_6] : memref<16x128xf32, #tpu.memory_space<vmem>>, vector<16x128xf32>
    tpu.vector_store %arg4[%c0_5, %c0_6], %5 {strides = array<i32>} : memref<16x128xf32, #tpu.memory_space<vmem>>, vector<16x128xf32>,
    return
  }
  func.func @transform_0(%arg0: i32) -> (i32, i32) {
    %c0_i32 = arith.constant 0 : i32
    %c0_i32_0 = arith.constant 0 : i32
    %c0_i32_1 = arith.constant 0 : i32
    return %c0_i32, %c0_i32_0 : i32, i32
  }
  func.func @transform_1(%arg0: i32) -> (i32, i32) {
    %c0_i32 = arith.constant 0 : i32
    %c0_i32_0 = arith.constant 0 : i32
    %c0_i32_1 = arith.constant 0 : i32
    return %c0_i32, %c0_i32_0 : i32, i32
  }
  func.func @transform_2(%arg0: i32) -> (i32, i32) {
    %c0_i32 = arith.constant 0 : i32
    %c0_i32_0 = arith.constant 0 : i32
    %c0_i32_1 = arith.constant 0 : i32
    return %c0_i32, %c0_i32_0 : i32, i32
  }
  func.func @transform_3(%arg0: i32) -> (i32, i32) {
    %c0_i32 = arith.constant 0 : i32
    %c0_i32_0 = arith.constant 0 : i32
    %c0_i32_1 = arith.constant 0 : i32
    return %c0_i32, %c0_i32_0 : i32, i32
  }
}

module attributes {stable_mosaic.version = 11 : i64} {
  func.func @_mm_kernel(%arg0: i32, %arg1: memref<4x144xbf16, #tpu.memory_space<vmem>>, %arg2: memref<144x128xbf16, #tpu.memory_space<vmem>>, %arg3: memref<4x1xf32, #tpu.memory_space<vmem>>, %arg4: memref<4x128xf32, #tpu.memory_space<vmem>>) attributes {dimension_semantics = [#tpu.dimension_semantics<arbitrary>], iteration_bounds = array<i64: 1>, scalar_prefetch = 0 : i64, scratch_operands = 0 : i64, tpu.core_type = #tpu.core_type<tc>, window_params = [{pipeline_mode = #tpu.pipeline_mode<synchronous>, transform_indices = @transform_0, window_bounds = array<i64: 4, 144>}, {pipeline_mode = #tpu.pipeline_mode<synchronous>, transform_indices = @transform_1, window_bounds = array<i64: 144, 128>}, {pipeline_mode = #tpu.pipeline_mode<synchronous>, transform_indices = @transform_2, window_bounds = array<i64: 4, 1>}, {pipeline_mode = #tpu.pipeline_mode<synchronous>, transform_indices = @transform_3, window_bounds = array<i64: 4, 128>}]} {
    %c0 = arith.constant 0 : index
    %c0_0 = arith.constant 0 : index
    %0 = vector.load %arg1[%c0, %c0_0] : memref<4x144xbf16, #tpu.memory_space<vmem>>, vector<4x144xbf16>
    %c0_1 = arith.constant 0 : index
    %c0_2 = arith.constant 0 : index
    %1 = vector.load %arg2[%c0_1, %c0_2] : memref<144x128xbf16, #tpu.memory_space<vmem>>, vector<144x128xbf16>
    %cst = arith.constant dense<0.000000e+00> : vector<4x128xf32>
    %2 = tpu.matmul %0, %1, %cst {dimension_numbers = #tpu.dot_dimension_numbers<[1], [0], [0], [1], [0, 0, 1, 1], [], []>} : vector<4x144xbf16>, vector<144x128xbf16>, vector<4x128xf32> -> vector<4x128xf32>
    %c0_3 = arith.constant 0 : index
    %c0_4 = arith.constant 0 : index
    %3 = vector.load %arg3[%c0_3, %c0_4] : memref<4x1xf32, #tpu.memory_space<vmem>>, vector<4x1xf32>
    %4 = vector.broadcast %3 : vector<4x1xf32> to vector<4x128xf32>
    %5 = arith.addf %2, %4 : vector<4x128xf32>
    %c0_5 = arith.constant 0 : index
    %c0_6 = arith.constant 0 : index
    %6 = vector.load %arg4[%c0_5, %c0_6] : memref<4x128xf32, #tpu.memory_space<vmem>>, vector<4x128xf32>
    tpu.vector_store %arg4[%c0_5, %c0_6], %5 {strides = array<i32>} : memref<4x128xf32, #tpu.memory_space<vmem>>, vector<4x128xf32>,
    return
  }
  func.func @transform_0(%arg0: i32) -> (i32, i32) {
    %c0_i32 = arith.constant 0 : i32
    %c0_i32_0 = arith.constant 0 : i32
    %c0_i32_1 = arith.constant 0 : i32
    return %c0_i32, %c0_i32_0 : i32, i32
  }
  func.func @transform_1(%arg0: i32) -> (i32, i32) {
    %c0_i32 = arith.constant 0 : i32
    %c0_i32_0 = arith.constant 0 : i32
    %c0_i32_1 = arith.constant 0 : i32
    return %c0_i32, %c0_i32_0 : i32, i32
  }
  func.func @transform_2(%arg0: i32) -> (i32, i32) {
    %c0_i32 = arith.constant 0 : i32
    %c0_i32_0 = arith.constant 0 : i32
    %c0_i32_1 = arith.constant 0 : i32
    return %c0_i32, %c0_i32_0 : i32, i32
  }
  func.func @transform_3(%arg0: i32) -> (i32, i32) {
    %c0_i32 = arith.constant 0 : i32
    %c0_i32_0 = arith.constant 0 : i32
    %c0_i32_1 = arith.constant 0 : i32
    return %c0_i32, %c0_i32_0 : i32, i32
  }
}

</mosaic_0001>

<bundles_post_ra>
// kernel: net_forward.41
= control target key start
LH: loop header
LB: loop body
LE: loop exit
PB: predicated region body
PF: predicated region fallthrough
CT: control target
= control target key end

     0   :  { %vm46_vm0 = vcmask 1043456   ;;  %vm47_vm1 = vcmask 1044480   ;;  %v173_v1 = vmov 0   ;;  %v174_v2 = vmov 65535   ;;  %s219_s1 = inlined_call_operand.vmem [shape: bf16[9,512], index: 1, kind: input, shape index: {}]   ;;  %s220_s2 = inlined_call_operand.vmem [shape: f32[4,1], index: 2, kind: input, shape index: {}]   ;;  %s221_s0 = inlined_call_operand.vmem [shape: bf16[4,9], index: 0, kind: input, shape index: {}]   ;;  %s222_s3 = inlined_call_operand.vmem [shape: f32[4,512], index: 3, kind: output, shape index: {}]  }
   0x1   :  { %v167_v0 = vld [vmem:[%s219_s1 + $0x4] ss:$16 sps:$4 sm:$0x1f]   ;;  %94 = vmatprep.mubr.bf16.mxu0 %v173_v1  ;;  %135 = vmatprep.mubr.bf16.mxu1 %v173_v1  ;;  %v48_v3 = vsel %vm46_vm0, 4294967295, %v174_v2  ;;  %v20_v10 = vld [vmem:[%s220_s2] sm:$0xf] }
   0x2   :  { %166 = vset.pattern.permute.xlu0 %v173_v1  ;;  %v49_v4 = vsel %vm47_vm1, %v48_v3, 0  ;;  %v169_v5 = vld [vmem:[%s219_s1 + $0xc] ss:$16 sps:$4 sm:$0x1f]   ;;  %v15_v13 = vld [vmem:[%s221_s0] sm:$0x3] }
   0x3   :  { %v54_v6 = vand.u32 %v167_v0, %v49_v4  ;;  %v171_v7 = vld [vmem:[%s219_s1] ss:$16 sps:$4 sm:$0x1f]   ;;  %v172_v8 = vld [vmem:[%s219_s1 + $0x8] ss:$16 sps:$4 sm:$0x1f]   ;;  %v60_v9 = vand.u32 %v169_v5, %v49_v4  ;;  %23 = vperm.xlu0 %166, %v20_v10  }
   0x4   :  { %v51_v11 = vand.u32 %v171_v7, %v49_v4  ;;  %v57_v12 = vand.u32 %v172_v8, %v49_v4  ;;  %vm42_vm2 = vcmask 72704  }
   0x5   :  { %62 = vmatprep.subr.bf16.mxu0 %v54_v6  ;;  %103 = vmatprep.subr.bf16.mxu1 %v60_v9 }
   0x6   :  { %63 = vmatpush1.bf16.msra.mxu0 %v51_v11  ;;  %104 = vmatpush1.bf16.msra.mxu1 %v57_v12 }
   0x9   :  { %162 = vmatmul.mubr.msk.bf16.vlgmr.msra.gmra.mrb[0].mxu0 %vm42_vm2, %v15_v13  ;;  %163 = vmatmul.mubr.msk.bf16.vlgmr.msra.gmra.mrb[0].mxu1 %vm42_vm2, %v15_v13 }
  0x82   :  { %v24_v14 = vpop.permute.xlu0 %23 }
  0xdc   :  { %v96_v15 = vpop.f32.mrb[0].mxu0  ;;  %v137_v16 = vpop.f32.mrb[0].mxu1 }
  0xdd   :  { %v97_v17 = vadd.f32 %v96_v15, %v24_v14  ;;  %v138_v18 = vadd.f32 %v137_v16, %v24_v14  ;;  %v98_v19 = vpop.f32.mrb[1].mxu0  ;;  %v139_v20 = vpop.f32.mrb[1].mxu1 }
  0xde   :  { %v99_v21 = vadd.f32 %v98_v19, %v24_v14  ;;  %v140_v22 = vadd.f32 %v139_v20, %v24_v14  ;;  %v100_v23 = vpop.f32.mrb[2].mxu0  ;;  %v141_v24 = vpop.f32.mrb[2].mxu1 }
  0xdf   :  { %v101_v25 = vpop.f32.mrb[3].mxu0  ;;  %v142_v26 = vpop.f32.mrb[3].mxu1 }
  0xe0   :  { %v148_v27 = vcombine.low %v97_v17, %v99_v21  ;;  %v149_v28 = vcombine.low %v138_v18, %v140_v22 }
  0xe2   :  { %152 = vst [vmem:[%s222_s3] sm:$0xff] %v148_v27  ;;  %153 = vst [vmem:[%s222_s3 + $0x8] sm:$0xff] %v149_v28 }

// kernel: squeeze.28
= control target key start
LH: loop header
LB: loop body
LE: loop exit
PB: predicated region body
PF: predicated region fallthrough
CT: control target
= control target key end

     0   :  { %s41_s0 = inlined_call_operand.vmem [shape: f32[512], index: 0, kind: input, shape index: {}]   ;;  %s42_s1 = inlined_call_operand.vmem [shape: f32[2,256], index: 1, kind: output, shape index: {}]  }
   0x1   :  { %v4_v0 = vld [vmem:[%s41_s0] sm:$0xf] }
   0x2   :  { %5 = vst [vmem:[#allocation1] sm:$0xf] %v4_v0 }
   0x9   :  { %v6_v1 = vld [vmem:[#allocation1] sm:$0xf]  }
   0xa   :  { %7 = vst [vmem:[#allocation0] ss:$8 sm:$0x3] %v6_v1   ;;  %9 = vst [vmem:[#allocation0 - $0xf] ss:$8 sm:$0xc] %v6_v1  }
  0x11   :  { %v13_v2 = vld [vmem:[#allocation0] sm:$0x3]  ;;  %v17_v3 = vld [vmem:[#allocation0 + $0x8] sm:$0x3] }
  0x12   :  { %15 = vst [vmem:[%s42_s1] sm:$0x3] %v13_v2  ;;  %21 = vst [vmem:[%s42_s1 + $0x2] sm:$0x3] %v17_v3 }

// kernel: net_forward.42
= control target key start
LH: loop header
LB: loop body
LE: loop exit
PB: predicated region body
PF: predicated region fallthrough
CT: control target
= control target key end

     0   :  { %v345_v0 = vmov 0   ;;  %v346_v9 = vmov 1   ;;  %vm101_vm0 = vcmask 1041408   ;;  %v347_v21 = vmov 2   ;;  %s451_s5 = inlined_call_operand.vmem [shape: f32[4,1], index: 5, kind: input, shape index: {}]   ;;  %s452_s4 = inlined_call_operand.vmem [shape: f32[4,2], index: 4, kind: input, shape index: {}]   ;;  %s453_s6 = inlined_call_operand.vmem [shape: f32[4,4], index: 6, kind: input, shape index: {}]   ;;  %s454_s0 = inlined_call_operand.vmem [shape: bf16[36,512], index: 0, kind: input, shape index: {}]   ;;  %s455_s7 = inlined_call_operand.vmem [shape: f32[4,1], index: 7, kind: input, shape index: {}]   ;;  %s456_s1 = inlined_call_operand.vmem [shape: bf16[4,36], index: 1, kind: input, shape index: {}]   ;;  %s457_s2 = inlined_call_operand.vmem [shape: f32[4,1], index: 2, kind: input, shape index: {}]   ;;  %s458_s3 = inlined_call_operand.vmem [shape: f32[2,2], index: 3, kind: input, shape index: {}]   ;;  %s459_s8 = inlined_call_operand.vmem [shape: f32[4,512], index: 8, kind: output, shape index: {}]  }
   0x1   :  { %324 = vset.pattern.permute.xlu1 %v345_v0  ;;  %322 = vset.pattern.permute.xlu0 %v345_v0  ;;  %v218_v1 = vld [vmem:[%s451_s5] sm:$0xf]  ;;  %v329_v4 = vld [vmem:[%s454_s0 + $0x4] ss:$16 sps:$4 sm:$0xff]   ;;  %v331_v5 = vld [vmem:[%s454_s0 + $0xc] ss:$16 sps:$4 sm:$0xff]   ;;  %v203_v26 = vlaneseq }
   0x2   :  { %v197_v2 = vld [vmem:[%s452_s4] sm:$0xf]  ;;  %221 = vperm.xlu1 %324, %v218_v1   ;;  %146 = vmatprep.mubr.bf16.mxu0 %v345_v0  ;;  %v334_v7 = vld [vmem:[%s454_s0 + $0x8] ss:$16 sps:$4 sm:$0xff]   ;;  %v335_v8 = vld [vmem:[%s454_s0 + $0x24] ss:$16 sps:$4 sm:$0xff]  }
   0x3   :  { %200 = vperm.xlu0 %322, %v197_v2   ;;  %v226_v3 = vld [vmem:[%s453_s6] sm:$0xf]  ;;  %187 = vmatprep.mubr.bf16.mxu1 %v345_v0  ;;  %v337_v10 = vld [vmem:[%s454_s0 + $0x2c] ss:$16 sps:$4 sm:$0xff]   ;;  %v340_v14 = vld [vmem:[%s454_s0 + $0x28] ss:$16 sps:$4 sm:$0xff]  }
   0x4   :  { %v333_v6 = vld [vmem:[%s454_s0] ss:$16 sps:$4 sm:$0xff]   ;;  %114 = vmatprep.subr.bf16.mxu0 %v329_v4  ;;  %155 = vmatprep.subr.bf16.mxu1 %v331_v5  ;;  %v40_v15 = vld [vmem:[%s454_s0 + $0x48] sm:$0x33]  ;;  %v348_v23 = vmov 3   ;;  %vm97_vm1 = vcmask 293888  }
   0x5   :  { %v227_v11 = vld [vmem:[%s455_s7] sm:$0xf]  ;;  %115 = vmatpush1.bf16.msra.mxu0 %v333_v6  ;;  %156 = vmatpush1.bf16.msra.mxu1 %v334_v7  ;;  %v313_v17 = vcombine.high %v40_v15, %v40_v15  ;;  %v312_v19 = vcombine.low %v40_v15, %v40_v15  ;;  %v204_v27 = vshrl.u32 %v203_v26, 7 }
   0x6   :  { %236 = vperm.xlu1 %324, %v226_v3   ;;  %v39_v12 = vld [vmem:[%s454_s0 + $0x40] sm:$0x33]  ;;  %116 = vmatprep.subr.bf16.mxu0 %v335_v8 }
   0x7   :  { %323 = vset.pattern.permute.xlu0 %v346_v9  ;;  %v339_v13 = vld [vmem:[%s454_s0 + $0x20] ss:$16 sps:$4 sm:$0xff]   ;;  %157 = vmatprep.subr.bf16.mxu1 %v337_v10  ;;  %v311_v16 = vcombine.high %v39_v12, %v39_v12  ;;  %v310_v18 = vcombine.low %v39_v12, %v39_v12  ;;  %v109_v22 = vsel %vm101_vm0, %v312_v19, 0  ;;  %v205_v28 = vsub.s32 0, %v204_v27 }
   0x8   :  { %209 = vperm.xlu0 %323, %v197_v2   ;;  %v30_v24 = vld [vmem:[%s456_s1] sm:$0x3]  ;;  %v214_v29 = vsub.s32 1, %v204_v27  ;;  %v261_v42 = vsub.s32 2, %v204_v27  ;;  %v271_v46 = vsub.s32 3, %v204_v27 }
   0x9   :  { %117 = vmatpush1.bf16.msra.mxu0 %v339_v13  ;;  %158 = vmatpush1.bf16.msra.mxu1 %v340_v14  ;;  %v103_v20 = vsel %vm101_vm0, %v310_v18, 0  ;;  %v41_v25 = vld [vmem:[%s457_s2] sm:$0xf] }
   0xa   :  { %230 = vperm.xlu1 %324, %v227_v11   ;;  %314 = vmatprep.subr.msk.bf16.mxu0 %vm101_vm0, %v311_v16  ;;  %v196_v30 = vld [vmem:[%s458_s3] sm:$0x3] }
   0xb   :  { %316 = vmatprep.subr.msk.bf16.mxu1 %vm101_vm0, %v313_v17  ;;  %v206_v33 = vrot.slane %v196_v30, %v205_v28  ;;  %v215_v34 = vrot.slane %v196_v30, %v214_v29 }
   0xc   :  { %246 = vperm.xlu0 %323, %v226_v3  }
   0xd   :  { %119 = vmatpush1.bf16.msra.mxu0 %v103_v20  ;;  %160 = vmatpush1.bf16.msra.mxu1 %v109_v22 }
   0xe   :  { %325 = vset.pattern.permute.xlu1 %v347_v21 }
   0xf   :  { %256 = vperm.xlu1 %325, %v226_v3  }
  0x10   :  { %326 = vset.pattern.permute.xlu0 %v348_v23  ;;  %315 = vmatmul.mubr.msk.bf16.vlgmr.msra.gmra.mrb[0].mxu0 %vm97_vm1, %v30_v24 }
  0x11   :  { %266 = vperm.xlu0 %326, %v226_v3   ;;  %317 = vmatmul.mubr.msk.bf16.vlgmr.msra.gmra.mrb[0].mxu1 %vm97_vm1, %v30_v24 }
  0x13   :  { %327 = vset.pattern.permute.xlu1 %v345_v0 }
  0x14   :  { %44 = vperm.xlu1 %327, %v41_v25  }
  0x15   :  { %328 = vset.pattern.permute.xlu0 %v346_v9 }
  0x81   :  { %v222_v32 = vpop.permute.xlu1 %221 }
  0x82   :  { %v201_v31 = vpop.permute.xlu0 %200 }
  0x83   :  { %v207_v36 = vmul.f32 %v206_v33, %v201_v31 }
  0x85   :  { %v237_v38 = vpop.permute.xlu1 %236 }
  0x87   :  { %v210_v35 = vpop.permute.xlu0 %209 }
  0x88   :  { %v216_v37 = vmul.f32 %v215_v34, %v210_v35 }
  0x89   :  { %v231_v43 = vpop.permute.xlu1 %230 }
  0x8a   :  { %v217_v39 = vadd.f32 %v216_v37, %v207_v36 }
  0x8b   :  { %v247_v47 = vpop.permute.xlu0 %246 }
  0x8c   :  { %v224_v40 = vadd.f32 %v222_v32, %v217_v39 }
  0x8e   :  { %v225_v41 = vmax.f32 %v224_v40, 0.0  ;;  %v257_v50 = vpop.permute.xlu1 %256 }
  0x90   :  { %v242_v44 = vrot.slane %v225_v41, %v205_v28  ;;  %v252_v45 = vrot.slane %v225_v41, %v214_v29  ;;  %v262_v49 = vrot.slane %v225_v41, %v261_v42  ;;  %v272_v53 = vrot.slane %v225_v41, %v271_v46  ;;  %v267_v54 = vpop.permute.xlu0 %266 }
  0x92   :  { %v243_v48 = vmul.f32 %v242_v44, %v237_v38  ;;  %v253_v52 = vmul.f32 %v252_v45, %v247_v47  ;;  %v263_v56 = vmul.f32 %v262_v49, %v257_v50  ;;  %v273_v58 = vmul.f32 %v272_v53, %v267_v54 }
  0x93   :  { %v45_v4 = vpop.permute.xlu1 %44 }
  0x94   :  { %v244_v51 = vadd.f32 %v243_v48, %v231_v43 }
  0x96   :  { %v254_v55 = vadd.f32 %v253_v52, %v244_v51 }
  0x98   :  { %v264_v57 = vadd.f32 %v263_v56, %v254_v55 }
  0x9a   :  { %v274_v59 = vadd.f32 %v273_v58, %v264_v57 }
  0x9c   :  { %288 = vperm.xlu0 %328, %v274_v59   ;;  %277 = vperm.xlu1 %327, %v274_v59  }
  0xe3   :  { %v148_v60 = vpop.f32.mrb[0].mxu0 }
  0xe4   :  { %v189_v61 = vpop.f32.mrb[0].mxu1  ;;  %v150_v62 = vpop.f32.mrb[1].mxu0  ;;  %v149_v7 = vadd.f32 %v148_v60, %v45_v4 }
  0xe5   :  { %v191_v63 = vpop.f32.mrb[1].mxu1  ;;  %v152_v0 = vpop.f32.mrb[2].mxu0  ;;  %v190_v5 = vadd.f32 %v189_v61, %v45_v4  ;;  %v151_v8 = vadd.f32 %v150_v62, %v45_v4 }
  0xe6   :  { %v193_v1 = vpop.f32.mrb[2].mxu1  ;;  %v153_v2 = vpop.f32.mrb[3].mxu0  ;;  %v192_v6 = vadd.f32 %v191_v63, %v45_v4 }
  0xe7   :  { %v194_v3 = vpop.f32.mrb[3].mxu1 }
 0x11b   :  { %v289_v9 = vpop.permute.xlu0 %288  ;;  %v278_v10 = vpop.permute.xlu1 %277 }
 0x11c   :  { %v291_v11 = vmul.f32 %v289_v9, %v190_v5  ;;  %v292_v12 = vmul.f32 %v289_v9, %v192_v6  ;;  %v280_v13 = vmul.f32 %v278_v10, %v149_v7  ;;  %v281_v14 = vmul.f32 %v278_v10, %v151_v8 }
 0x11e   :  { %v295_v15 = vcombine.low %v291_v11, %v292_v12  ;;  %v284_v16 = vcombine.low %v280_v13, %v281_v14 }
 0x120   :  { %297 = vst [vmem:[%s459_s8 + $0x8] sm:$0xff] %v295_v15  ;;  %286 = vst [vmem:[%s459_s8] sm:$0xff] %v284_v16 }

// kernel: net_forward.47
= control target key start
LH: loop header
LB: loop body
LE: loop exit
PB: predicated region body
PF: predicated region fallthrough
CT: control target
= control target key end

     0   :  { %v243_v1 = vmov 0   ;;  %vm86_vm0 = vcmask 1041408   ;;  %vm82_vm1 = vcmask 293888   ;;  %v244_v19 = vmov 1983009808   ;;  %s308_s1 = inlined_call_operand.vmem [shape: bf16[36,512], index: 1, kind: input, shape index: {}]   ;;  %s309_s2 = inlined_call_operand.vmem [shape: f32[2,1], index: 2, kind: input, shape index: {}]   ;;  %s310_s0 = inlined_call_operand.vmem [shape: bf16[2,36], index: 0, kind: input, shape index: {}]   ;;  %s311_s3 = inlined_call_operand.vmem [shape: f32[2,512], index: 3, kind: output, shape index: {}]  }
   0x1   :  { %v227_v0 = vld [vmem:[%s308_s1 + $0x4] ss:$16 sps:$4 sm:$0xff]   ;;  %131 = vmatprep.mubr.bf16.mxu0 %v243_v1  ;;  %172 = vmatprep.mubr.bf16.mxu1 %v243_v1  ;;  %v229_v2 = vld [vmem:[%s308_s1 + $0xc] ss:$16 sps:$4 sm:$0xff]   ;;  %v231_v3 = vld [vmem:[%s308_s1] ss:$16 sps:$4 sm:$0xff]   ;;  %v188_v20 = vunpack.c.l.s4 %v244_v19  ;;  %v190_v21 = vlaneseq }
   0x2   :  { %226 = vset.pattern.permute.xlu0 %v243_v1  ;;  %99 = vmatprep.subr.bf16.mxu0 %v227_v0  ;;  %v232_v4 = vld [vmem:[%s308_s1 + $0x8] ss:$16 sps:$4 sm:$0xff]   ;;  %v233_v5 = vld [vmem:[%s308_s1 + $0x24] ss:$16 sps:$4 sm:$0xff]   ;;  %v235_v6 = vld [vmem:[%s308_s1 + $0x2c] ss:$16 sps:$4 sm:$0xff]  }
   0x3   :  { %140 = vmatprep.subr.bf16.mxu1 %v229_v2  ;;  %100 = vmatpush1.bf16.msra.mxu0 %v231_v3  ;;  %v237_v7 = vld [vmem:[%s308_s1 + $0x20] ss:$16 sps:$4 sm:$0xff]   ;;  %v238_v8 = vld [vmem:[%s308_s1 + $0x28] ss:$16 sps:$4 sm:$0xff]   ;;  %v189_v23 = vunpack.c.0.s8 %v188_v20  ;;  %v191_v24 = vshrl.u32 %v190_v21, 7 }
   0x4   :  { %141 = vmatpush1.bf16.msra.mxu1 %v232_v4  ;;  %101 = vmatprep.subr.bf16.mxu0 %v233_v5  ;;  %v24_v9 = vld [vmem:[%s308_s1 + $0x40] sm:$0x33]  ;;  %v25_v10 = vld [vmem:[%s308_s1 + $0x48] sm:$0x33] }
   0x5   :  { %142 = vmatprep.subr.bf16.mxu1 %v235_v6  ;;  %v217_v11 = vcombine.high %v24_v9, %v24_v9  ;;  %v219_v12 = vcombine.high %v25_v10, %v25_v10  ;;  %v216_v13 = vcombine.low %v24_v9, %v24_v9  ;;  %v218_v14 = vcombine.low %v25_v10, %v25_v10  ;;  %v26_v15 = vld [vmem:[%s309_s2] sm:$0x3] }
   0x6   :  { %29 = vperm.xlu0 %226, %v26_v15   ;;  %v15_v18 = vld [vmem:[%s310_s0] sm:$0x1]  ;;  %v192_v32 = vsub.s32 %v189_v23, %v191_v24 }
   0x7   :  { %102 = vmatpush1.bf16.msra.mxu0 %v237_v7  ;;  %v88_v16 = vsel %vm86_vm0, %v216_v13, 0  ;;  %v94_v17 = vsel %vm86_vm0, %v218_v14, 0 }
   0x8   :  { %143 = vmatpush1.bf16.msra.mxu1 %v238_v8  ;;  %220 = vmatprep.subr.msk.bf16.mxu0 %vm86_vm0, %v217_v11 }
   0x9   :  { %222 = vmatprep.subr.msk.bf16.mxu1 %vm86_vm0, %v219_v12 }
   0xb   :  { %104 = vmatpush1.bf16.msra.mxu0 %v88_v16 }
   0xc   :  { %145 = vmatpush1.bf16.msra.mxu1 %v94_v17 }
   0xe   :  { %221 = vmatmul.mubr.msk.bf16.vlgmr.msra.gmra.mrb[0].mxu0 %vm82_vm1, %v15_v18 }
   0xf   :  { %223 = vmatmul.mubr.msk.bf16.vlgmr.msra.gmra.mrb[0].mxu1 %vm82_vm1, %v15_v18 }
  0x85   :  { %v30_v22 = vpop.permute.xlu0 %29 }
  0xe1   :  { %v133_v25 = vpop.f32.mrb[0].mxu0 }
  0xe2   :  { %v174_v26 = vpop.f32.mrb[0].mxu1  ;;  %v134_v27 = vadd.f32 %v133_v25, %v30_v22  ;;  %v135_v29 = vpop.f32.mrb[1].mxu0 }
  0xe3   :  { %v175_v28 = vadd.f32 %v174_v26, %v30_v22  ;;  %v176_v30 = vpop.f32.mrb[1].mxu1  ;;  %v136_v31 = vadd.f32 %v135_v29, %v30_v22  ;;  %v137_v34 = vpop.f32.mrb[2].mxu0 }
  0xe4   :  { %v177_v33 = vadd.f32 %v176_v30, %v30_v22  ;;  %v178_v35 = vpop.f32.mrb[2].mxu1  ;;  %v138_v36 = vpop.f32.mrb[3].mxu0 }
  0xe5   :  { %v179_v37 = vpop.f32.mrb[3].mxu1  ;;  %v185_v38 = vcombine.low %v134_v27, %v136_v31 }
  0xe6   :  { %v186_v39 = vcombine.low %v175_v28, %v177_v33 }
  0xe7   :  { %v193_v40 = vrot.slane %v185_v38, %v192_v32 }
  0xe8   :  { %v200_v41 = vrot.slane %v186_v39, %v192_v32 }
  0xea   :  { %v201_v42 = vcombine.low %v193_v40, %v200_v41 }
  0xec   :  { %203 = vst [vmem:[%s311_s3] sm:$0xff] %v201_v42 }

// kernel: net_forward.49
= control target key start
LH: loop header
LB: loop body
LE: loop exit
PB: predicated region body
PF: predicated region fallthrough
CT: control target
= control target key end

     0   :  { %vm30_vm0 = vcmask 130048   ;;  %v138_v3 = vmov 0   ;;  %vm112_vm1 = vcmask 261120   ;;  %s185_s1 = inlined_call_operand.vmem [shape: f32[16,32], index: 1, kind: input, shape index: {}]   ;;  %s186_s0 = inlined_call_operand.vmem [shape: f32[16,16], index: 0, kind: input, shape index: {}]   ;;  %s187_s2 = inlined_call_operand.vmem [shape: f32[16,1], index: 2, kind: input, shape index: {}]   ;;  %s188_s3 = inlined_call_operand.vmem [shape: f32[16,32], index: 3, kind: output, shape index: {}]  }
   0x1   :  { %v16_v0 = vld [vmem:[%s185_s1] sm:$0xff]  ;;  %v17_v1 = vld [vmem:[%s185_s1 + $0x8] sm:$0xff]  ;;  %137 = vset.pattern.permute.xlu0 %v138_v3 }
   0x2   :  { %v14_v2 = vld [vmem:[%s186_s0] sm:$0xff]  ;;  %v132_v4 = vpack.c.bf16 %v17_v1, %v16_v0  ;;  %v19_v6 = vld [vmem:[%s187_s2 + $0x8] sm:$0xff] }
   0x3   :  { %129 = vmatprep.mubr.msk.f32.mxu0 %vm30_vm0, %v14_v2  ;;  %v18_v5 = vld [vmem:[%s187_s2] sm:$0xff]  ;;  %v15_v7 = vld [vmem:[%s186_s0 + $0x8] sm:$0xff] }
   0x4   :  { %22 = vperm.xlu0 %137, %v18_v5   ;;  %133 = vmatprep.subr.bf16.mxu0 %v132_v4 }
   0x5   :  { %135 = vmatpush3.bf16.msra.mxu0 %v132_v4 }
   0x8   :  { %27 = vperm.xlu0 %137, %v19_v6   ;;  %130 = vmatmul.mubr.msk.f32.vlgmr.msra.gmra.mrb[0].mxu0 %vm30_vm0, %v15_v7 }
  0x83   :  { %v23_v8 = vpop.permute.xlu0 %22 }
  0x87   :  { %v28_v9 = vpop.permute.xlu0 %27 }
  0xdb   :  { %v131_v10 = vpop.f32.mrb[0].mxu0 }
  0xdc   :  { %v109_v11 = vadd.f32 %v131_v10, %v28_v9  ;;  %v103_v12 = vpop.f32.mrb[1].mxu0 }
  0xdd   :  { %v104_v13 = vadd.f32 %v103_v12, %v23_v8 }
  0xde   :  { %114 = vst.msk [vmem:[%s188_s3 + $0x8] sm:$0xff] %vm112_vm1, %v109_v11 }
  0xdf   :  { %113 = vst.msk [vmem:[%s188_s3] sm:$0xff] %vm112_vm1, %v104_v13 }

// kernel: net_forward.48
= control target key start
LH: loop header
LB: loop body
LE: loop exit
PB: predicated region body
PF: predicated region fallthrough
CT: control target
= control target key end

     0   :  { %vm33_vm0 = vcmask 130048   ;;  %v171_v3 = vmov 0   ;;  %v172_v10 = vmov 1   ;;  %vm141_vm1 = vcmask 261248   ;;  %s238_s1 = inlined_call_operand.vmem [shape: f32[16,32], index: 1, kind: input, shape index: {}]   ;;  %s239_s0 = inlined_call_operand.vmem [shape: f32[16,16], index: 0, kind: input, shape index: {}]   ;;  %s240_s3 = inlined_call_operand.vmem [shape: f32[16,2], index: 3, kind: input, shape index: {}]   ;;  %s241_s2 = inlined_call_operand.vmem [shape: f32[16,1], index: 2, kind: input, shape index: {}]   ;;  %s242_s4 = inlined_call_operand.vmem [shape: f32[16,32], index: 4, kind: output, shape index: {}]  }
   0x1   :  { %v19_v0 = vld [vmem:[%s238_s1] sm:$0xff]  ;;  %v20_v1 = vld [vmem:[%s238_s1 + $0x8] sm:$0xff]  ;;  %168 = vset.pattern.permute.xlu1 %v171_v3  ;;  %167 = vset.pattern.permute.xlu0 %v171_v3 }
   0x2   :  { %v17_v2 = vld [vmem:[%s239_s0] sm:$0xff]  ;;  %v161_v4 = vpack.c.bf16 %v20_v1, %v19_v0  ;;  %v116_v7 = vld [vmem:[%s240_s3 + $0x8] sm:$0xff] }
   0x3   :  { %158 = vmatprep.mubr.msk.f32.mxu0 %vm33_vm0, %v17_v2  ;;  %v115_v5 = vld [vmem:[%s240_s3] sm:$0xff]  ;;  %v22_v8 = vld [vmem:[%s241_s2 + $0x8] sm:$0xff] }
   0x4   :  { %v21_v6 = vld [vmem:[%s241_s2] sm:$0xff]  ;;  %119 = vperm.xlu1 %168, %v115_v5   ;;  %162 = vmatprep.subr.bf16.mxu0 %v161_v4  ;;  %v18_v9 = vld [vmem:[%s239_s0 + $0x8] sm:$0xff] }
   0x5   :  { %25 = vperm.xlu0 %167, %v21_v6   ;;  %164 = vmatpush3.bf16.msra.mxu0 %v161_v4 }
   0x8   :  { %124 = vperm.xlu1 %168, %v116_v7   ;;  %159 = vmatmul.mubr.msk.f32.vlgmr.msra.gmra.mrb[0].mxu0 %vm33_vm0, %v18_v9 }
   0x9   :  { %30 = vperm.xlu0 %167, %v22_v8  }
   0xc   :  { %170 = vset.pattern.permute.xlu1 %v172_v10 }
   0xd   :  { %169 = vset.pattern.permute.xlu0 %v172_v10  ;;  %136 = vperm.xlu1 %170, %v116_v7  }
   0xe   :  { %132 = vperm.xlu0 %169, %v115_v5  }
  0x83   :  { %v120_v11 = vpop.permute.xlu1 %119 }
  0x84   :  { %v26_v12 = vpop.permute.xlu0 %25 }
  0x87   :  { %v125_v13 = vpop.permute.xlu1 %124 }
  0x88   :  { %v31_v14 = vpop.permute.xlu0 %30 }
  0x8c   :  { %v137_v16 = vpop.permute.xlu1 %136 }
  0x8d   :  { %v133_v19 = vpop.permute.xlu0 %132 }
  0xdb   :  { %v160_v15 = vpop.f32.mrb[0].mxu0 }
  0xdc   :  { %v112_v17 = vadd.f32 %v160_v15, %v31_v14  ;;  %v106_v18 = vpop.f32.mrb[1].mxu0 }
  0xdd   :  { %v107_v20 = vadd.f32 %v106_v18, %v26_v12 }
  0xde   :  { %v128_v21 = vmul.f32 %v125_v13, %v112_v17  ;;  %v140_v22 = vmul.f32 %v137_v16, %v112_v17 }
  0xdf   :  { %v127_v23 = vmul.f32 %v120_v11, %v107_v20  ;;  %v139_v24 = vmul.f32 %v133_v19, %v107_v20 }
  0xe0   :  { %130 = vst.msk [vmem:[%s242_s4 + $0x8] sm:$0xff] %vm33_vm0, %v128_v21 }
  0xe1   :  { %129 = vst.msk [vmem:[%s242_s4] sm:$0xff] %vm33_vm0, %v127_v23 }
  0xe2   :  { %143 = vst.msk [vmem:[%s242_s4 + $0x8] sm:$0xff] %vm141_vm1, %v140_v22  ;;  %142 = vst.msk [vmem:[%s242_s4] sm:$0xff] %vm141_vm1, %v139_v24 }

// kernel: net_forward.50
= control target key start
LH: loop header
LB: loop body
LE: loop exit
PB: predicated region body
PF: predicated region fallthrough
CT: control target
= control target key end

     0   :  { %vm20_vm0 = vcmask 130048   ;;  %s491_s0 = inlined_call_operand.vmem [shape: f32[2,16,16], index: 0, kind: input, shape index: {}]   ;;  %s492_s1 = inlined_call_operand.vmem [shape: f32[16,16], index: 1, kind: input, shape index: {}]   ;;  %s493_s2 = inlined_call_operand.vmem [shape: f32[16,16], index: 2, kind: input, shape index: {}]   ;;  %s494_s3 = inlined_call_operand.vmem [shape: f32[2,16,16], index: 3, kind: output, shape index: {}]  }
   0x1   :  { %v18_v0 = vld [vmem:[%s491_s0] sm:$0xff]  ;;  %v19_v1 = vld [vmem:[%s491_s0 + $0x8] sm:$0xff]  ;;  %v355_v4 = vld [vmem:[%s491_s0 + $0x10] sm:$0xff] }
   0x2   :  { %v14_v2 = vld [vmem:[%s492_s1] sm:$0xff]  ;;  %v407_v3 = vpack.c.bf16 %v19_v1, %v18_v0  ;;  %v356_v5 = vld [vmem:[%s491_s0 + $0x18] sm:$0xff]  ;;  %v17_v8 = vld [vmem:[%s493_s2 + $0x8] sm:$0xff] }
   0x3   :  { %383 = vmatprep.mubr.msk.f32.mxu0 %vm20_vm0, %v14_v2  ;;  %v415_v6 = vpack.c.bf16 %v356_v5, %v355_v4  ;;  %v16_v7 = vld [vmem:[%s493_s2] sm:$0xff]  ;;  %v15_v10 = vld [vmem:[%s492_s1 + $0x8] sm:$0xff] }
   0x4   :  { %408 = vmatprep.subr.bf16.mxu0 %v407_v3  ;;  %v411_v9 = vpack.c.bf16 %v17_v8, %v16_v7 }
   0x5   :  { %410 = vmatpush3.bf16.msra.mxu0 %v407_v3 }
   0x6   :  { %416 = vmatprep.subr.bf16.mxu0 %v415_v6  ;;  %412 = vmatprep.subr.bf16.mxu1 %v411_v9 }
   0x7   :  { %414 = vmatpush3.bf16.msra.mxu1 %v411_v9 }
   0x8   :  { %384 = vmatmul.mubr.msk.f32.vlgmr.msra.gmra.mrb[0].mxu0 %vm20_vm0, %v15_v10  ;;  %420 = vmatprep.subr.bf16.mxu1 %v411_v9 }
   0x9   :  { %418 = vmatpush3.bf16.msra.mxu0 %v415_v6  ;;  %397 = vmatprep.mubr.msk.f32.mxu0 %vm20_vm0, %v14_v2 }
   0xc   :  { %398 = vmatmul.mubr.msk.f32.vlgmr.msra.gmra.mrb[2].mxu0 %vm20_vm0, %v15_v10 }
  0xdb   :  { %v385_v11 = vpop.f32.mrb[0].mxu0 }
  0xdc   :  { %v93_v12 = vpop.f32.mrb[1].mxu0 }
  0xdd   :  { %390 = vmatprep.mubr.msk.f32.mxu1 %vm20_vm0, %v93_v12 }
  0xde   :  { %391 = vmatmul.mubr.msk.f32.vlgmr.msra.gmra.mrb[0].mxu1 %vm20_vm0, %v385_v11 }
  0xdf   :  { %v399_v13 = vpop.f32.mrb[2].mxu0  ;;  %422 = vmatpush3.bf16.msra.mxu1 %v411_v9 }
  0xe0   :  { %v254_v14 = vpop.f32.mrb[3].mxu0 }
  0xe1   :  { %404 = vmatprep.mubr.msk.f32.mxu1 %vm20_vm0, %v254_v14 }
  0xe2   :  { %405 = vmatmul.mubr.msk.f32.vlgmr.msra.gmra.mrb[2].mxu1 %vm20_vm0, %v399_v13 }
 0x1b1   :  { %v392_v15 = vpop.f32.mrb[0].mxu1 }
 0x1b2   :  { %184 = vst.msk [vmem:[%s494_s3 + $0x8] sm:$0xff] %vm20_vm0, %v392_v15  ;;  %v174_v16 = vpop.f32.mrb[1].mxu1 }
 0x1b3   :  { %183 = vst.msk [vmem:[%s494_s3] sm:$0xff] %vm20_vm0, %v174_v16 }
 0x1b5   :  { %v406_v17 = vpop.f32.mrb[2].mxu1 }
 0x1b6   :  { %362 = vst.msk [vmem:[%s494_s3 + $0x18] sm:$0xff] %vm20_vm0, %v406_v17  ;;  %v335_v18 = vpop.f32.mrb[3].mxu1 }
 0x1b7   :  { %361 = vst.msk [vmem:[%s494_s3 + $0x10] sm:$0xff] %vm20_vm0, %v335_v18 }

// kernel: net_forward.52
= control target key start
LH: loop header
LB: loop body
LE: loop exit
PB: predicated region body
PF: predicated region fallthrough
CT: control target
= control target key end

     0   :  { %v162_v0 = vmov 0.0   ;;  %vm163_vm0 = vmmov 0   ;;  %v164_v2 = vmov 0   ;;  %vm74_vm1 = vcmask 1043456   ;;  %s215_s1 = inlined_call_operand.vmem [shape: bf16[72,128], index: 1, kind: input, shape index: {}]   ;;  %s216_s2 = inlined_call_operand.vmem [shape: f32[16,1], index: 2, kind: input, shape index: {}]   ;;  %s217_s0 = inlined_call_operand.vmem [shape: bf16[16,72], index: 0, kind: input, shape index: {}]   ;;  %s218_s3 = inlined_call_operand.vmem [shape: f32[16,128], index: 3, kind: output, shape index: {}]  }
   0x1   :  { %138 = vmatprep.subr.bf16.mxu0 %v162_v0  ;;  %v156_v1 = vld [vmem:[%s215_s1] sm:$0xff]   ;;  %148 = vmatprep.mubr.msk.bf16.mxu0 %vm163_vm0, %v162_v0  ;;  %v157_v3 = vld [vmem:[%s215_s1 + $0x8] sm:$0xff]   ;;  %v158_v5 = vld [vmem:[%s215_s1 + $0x10] sm:$0xff]   ;;  %vm70_vm2 = vcmask 588800  }
   0x2   :  { %155 = vset.pattern.permute.xlu0 %v164_v2  ;;  %139 = vmatpush3.bf16.msra.mxu0 %v156_v1  ;;  %v26_v4 = vld [vmem:[%s216_s2] sm:$0xff]  ;;  %v27_v6 = vld [vmem:[%s216_s2 + $0x8] sm:$0xff]  ;;  %v159_v7 = vld [vmem:[%s215_s1 + $0x18] sm:$0xff]  }
   0x3   :  { %140 = vmatprep.subr.bf16.mxu0 %v162_v0  ;;  %30 = vperm.xlu0 %155, %v26_v4   ;;  %v160_v8 = vld [vmem:[%s215_s1 + $0x20] ss:$0 sps:$4 sm:$0xff]  }
   0x4   :  { %v76_v9 = vsel %vm74_vm1, %v160_v8, 0  ;;  %v161_v10 = vld [vmem:[%s217_s0] sm:$0xff]  }
   0x6   :  { %141 = vmatpush3.bf16.msra.mxu0 %v157_v3 }
   0x7   :  { %142 = vmatprep.subr.bf16.mxu0 %v162_v0  ;;  %35 = vperm.xlu0 %155, %v27_v6  }
   0xa   :  { %143 = vmatpush3.bf16.msra.mxu0 %v158_v5 }
   0xb   :  { %144 = vmatprep.subr.bf16.mxu0 %v162_v0 }
   0xe   :  { %145 = vmatpush3.bf16.msra.mxu0 %v159_v7 }
   0xf   :  { %146 = vmatprep.subr.bf16.mxu0 %v162_v0 }
  0x12   :  { %147 = vmatpush3.bf16.msra.mxu0 %v76_v9 }
  0x15   :  { %149 = vmatmul.mubr.msk.bf16.vlgmr.msra.gmra.mrb[0].mxu0 %vm70_vm2, %v161_v10 }
  0x82   :  { %v31_v11 = vpop.permute.xlu0 %30 }
  0x86   :  { %v36_v15 = vpop.permute.xlu0 %35 }
  0xe8   :  { %v112_v12 = vpop.f32.mrb[0].mxu0 }
  0xe9   :  { %v113_v13 = vadd.f32 %v112_v12, %v31_v11  ;;  %v150_v14 = vpop.f32.mrb[1].mxu0 }
  0xea   :  { %v115_v16 = vpop.f32.mrb[2].mxu0 }
  0xeb   :  { %119 = vst [vmem:[%s218_s3] sm:$0xff] %v113_v13  ;;  %v116_v17 = vadd.f32 %v115_v16, %v36_v15  ;;  %v151_v18 = vpop.f32.mrb[3].mxu0 }
  0xed   :  { %120 = vst [vmem:[%s218_s3 + $0x8] sm:$0xff] %v116_v17 }

// kernel: sub.10
= control target key start
LH: loop header
LB: loop body
LE: loop exit
PB: predicated region body
PF: predicated region fallthrough
CT: control target
= control target key end

     0   :  { %s56_s0 = inlined_call_operand.vmem [shape: f32[16,32], index: 0, kind: input, shape index: {}]   ;;  %s57_s1 = inlined_call_operand.vmem [shape: f32[16,32], index: 1, kind: input, shape index: {}]   ;;  %s58_s2 = inlined_call_operand.vmem [shape: f32[16,32], index: 2, kind: output, shape index: {}]  }
   0x1   :  { %v3_v0 = vld [vmem:[%s56_s0] sm:$0xff]  ;;  %v20_v2 = vld [vmem:[%s56_s0 + $0x8] sm:$0xff] }
   0x2   :  { %v4_v1 = vld [vmem:[%s57_s1] sm:$0xff]  ;;  %v21_v4 = vld [vmem:[%s57_s1 + $0x8] sm:$0xff] }
   0x3   :  { %v7_v3 = vsub.f32 %v3_v0, %v4_v1  ;;  %v16_v5 = vsub.f32 %v20_v2, %v21_v4 }
   0x5   :  { %9 = vst [vmem:[%s58_s2] sm:$0xff] %v7_v3  ;;  %22 = vst [vmem:[%s58_s2 + $0x8] sm:$0xff] %v16_v5 }

// kernel: net_forward.53
= control target key start
LH: loop header
LB: loop body
LE: loop exit
PB: predicated region body
PF: predicated region fallthrough
CT: control target
= control target key end

     0   :  { %vm53_vm0 = vcmask 1043456   ;;  %vm54_vm1 = vcmask 1044480   ;;  %v196_v1 = vmov 0   ;;  %v197_v2 = vmov 65535   ;;  %s261_s1 = inlined_call_operand.vmem [shape: bf16[9,512], index: 1, kind: input, shape index: {}]   ;;  %s262_s2 = inlined_call_operand.vmem [shape: f32[4,1], index: 2, kind: input, shape index: {}]   ;;  %s263_s0 = inlined_call_operand.vmem [shape: bf16[4,9], index: 0, kind: input, shape index: {}]   ;;  %s264_s3 = inlined_call_operand.vmem [shape: f32[4,512], index: 3, kind: input, shape index: {}]   ;;  %s265_s4 = inlined_call_operand.<no memory space> [shape: f32[1], index: 4, kind: input, shape index: {}]   ;;  %s266_s5 = inlined_call_operand.vmem [shape: f32[4,512], index: 5, kind: output, shape index: {}]  }
   0x1   :  { %v190_v0 = vld [vmem:[%s261_s1 + $0x4] ss:$16 sps:$4 sm:$0x1f]   ;;  %101 = vmatprep.mubr.bf16.mxu0 %v196_v1  ;;  %142 = vmatprep.mubr.bf16.mxu1 %v196_v1  ;;  %v55_v3 = vsel %vm53_vm0, 4294967295, %v197_v2  ;;  %v27_v10 = vld [vmem:[%s262_s2] sm:$0xf]  ;;  %v154_v15 = vstv %s265_s4 }
   0x2   :  { %189 = vset.pattern.permute.xlu0 %v196_v1  ;;  %v56_v4 = vsel %vm54_vm1, %v55_v3, 0  ;;  %v192_v5 = vld [vmem:[%s261_s1 + $0xc] ss:$16 sps:$4 sm:$0x1f]   ;;  %v22_v13 = vld [vmem:[%s263_s0] sm:$0x3] }
   0x3   :  { %v61_v6 = vand.u32 %v190_v0, %v56_v4  ;;  %v194_v7 = vld [vmem:[%s261_s1] ss:$16 sps:$4 sm:$0x1f]   ;;  %v195_v8 = vld [vmem:[%s261_s1 + $0x8] ss:$16 sps:$4 sm:$0x1f]   ;;  %v67_v9 = vand.u32 %v192_v5, %v56_v4  ;;  %30 = vperm.xlu0 %189, %v27_v10  }
   0x4   :  { %v58_v11 = vand.u32 %v194_v7, %v56_v4  ;;  %v64_v12 = vand.u32 %v195_v8, %v56_v4  ;;  %vm49_vm2 = vcmask 72704   ;;  %v152_v14 = vld [vmem:[%s264_s3] sm:$0xff]  ;;  %v153_v16 = vld [vmem:[%s264_s3 + $0x8] sm:$0xff] }
   0x5   :  { %69 = vmatprep.subr.bf16.mxu0 %v61_v6  ;;  %110 = vmatprep.subr.bf16.mxu1 %v67_v9  ;;  %v155_v17 = vmul.f32 %v154_v15, %v152_v14  ;;  %v156_v18 = vmul.f32 %v154_v15, %v153_v16 }
   0x6   :  { %70 = vmatpush1.bf16.msra.mxu0 %v58_v11  ;;  %111 = vmatpush1.bf16.msra.mxu1 %v64_v12 }
   0x7   :  { %v159_v22 = vcombine.high %v155_v17, %v155_v17  ;;  %v160_v23 = vcombine.high %v156_v18, %v156_v18 }
   0x9   :  { %185 = vmatmul.mubr.msk.bf16.vlgmr.msra.gmra.mrb[0].mxu0 %vm49_vm2, %v22_v13  ;;  %186 = vmatmul.mubr.msk.bf16.vlgmr.msra.gmra.mrb[0].mxu1 %vm49_vm2, %v22_v13 }
  0x82   :  { %v31_v19 = vpop.permute.xlu0 %30 }
  0xdc   :  { %v103_v20 = vpop.f32.mrb[0].mxu0  ;;  %v144_v21 = vpop.f32.mrb[0].mxu1 }
  0xdd   :  { %v104_v24 = vadd.f32 %v103_v20, %v31_v19  ;;  %v145_v25 = vadd.f32 %v144_v21, %v31_v19  ;;  %v105_v26 = vpop.f32.mrb[1].mxu0  ;;  %v146_v27 = vpop.f32.mrb[1].mxu1 }
  0xde   :  { %v106_v28 = vadd.f32 %v105_v26, %v31_v19  ;;  %v147_v29 = vadd.f32 %v146_v27, %v31_v19  ;;  %v107_v30 = vpop.f32.mrb[2].mxu0  ;;  %v148_v31 = vpop.f32.mrb[2].mxu1 }
  0xdf   :  { %v163_v32 = vadd.f32 %v155_v17, %v104_v24  ;;  %v165_v33 = vadd.f32 %v156_v18, %v145_v25  ;;  %v108_v34 = vpop.f32.mrb[3].mxu0  ;;  %v149_v35 = vpop.f32.mrb[3].mxu1 }
  0xe0   :  { %v164_v36 = vadd.f32 %v159_v22, %v106_v28  ;;  %v166_v37 = vadd.f32 %v160_v23, %v147_v29 }
  0xe2   :  { %v171_v38 = vcombine.low %v163_v32, %v164_v36  ;;  %v172_v39 = vcombine.low %v165_v33, %v166_v37 }
  0xe4   :  { %175 = vst [vmem:[%s266_s5] sm:$0xff] %v171_v38  ;;  %176 = vst [vmem:[%s266_s5 + $0x8] sm:$0xff] %v172_v39 }

// kernel: net_forward.64
= control target key start
LH: loop header
LB: loop body
LE: loop exit
PB: predicated region body
PF: predicated region fallthrough
CT: control target
= control target key end

     0   :  { %v187_v0 = vmov 0   ;;  %vm110_vm0 = vcmask 130048   ;;  %s253_s1 = inlined_call_operand.vmem [shape: bf16[144,128], index: 1, kind: input, shape index: {}]   ;;  %s254_s0 = inlined_call_operand.vmem [shape: bf16[16,144], index: 0, kind: input, shape index: {}]   ;;  %s255_s2 = inlined_call_operand.vmem [shape: f32[16,1], index: 2, kind: input, shape index: {}]   ;;  %s256_s3 = inlined_call_operand.vmem [shape: f32[16,128], index: 3, kind: output, shape index: {}]  }
   0x1   :  { %114 = vmatprep.subr.bf16.mxu0 %v187_v0  ;;  %v175_v1 = vld [vmem:[%s253_s1] sm:$0xff]   ;;  %174 = vset.pattern.permute.xlu0 %v187_v0  ;;  %v176_v2 = vld [vmem:[%s253_s1 + $0x8] sm:$0xff]   ;;  %v177_v3 = vld [vmem:[%s253_s1 + $0x10] sm:$0xff]  }
   0x2   :  { %115 = vmatpush1.bf16.msra.mxu0 %v175_v1  ;;  %v178_v4 = vld [vmem:[%s253_s1 + $0x18] sm:$0xff]   ;;  %v186_v5 = vld [vmem:[%s254_s0 + $0x4] ss:$8 sps:$4 sm:$0xff]   ;;  %v181_v10 = vld [vmem:[%s253_s1 + $0x30] sm:$0xff]  }
   0x3   :  { %116 = vmatprep.subr.bf16.mxu0 %v187_v0  ;;  %v35_v6 = vld [vmem:[%s255_s2] sm:$0xff]  ;;  %172 = vmatprep.mubr.msk.bf16.mxu0 %vm110_vm0, %v186_v5  ;;  %v36_v7 = vld [vmem:[%s255_s2 + $0x8] sm:$0xff]  ;;  %v182_v11 = vld [vmem:[%s253_s1 + $0x38] sm:$0xff]  }
   0x4   :  { %39 = vperm.xlu0 %174, %v35_v6   ;;  %v179_v8 = vld [vmem:[%s253_s1 + $0x20] sm:$0xff]   ;;  %v180_v9 = vld [vmem:[%s253_s1 + $0x28] sm:$0xff]  }
   0x5   :  { %v183_v12 = vld [vmem:[%s253_s1 + $0x40] sm:$0xff]  }
   0x6   :  { %117 = vmatpush1.bf16.msra.mxu0 %v176_v2  ;;  %v184_v13 = vld [vmem:[%s254_s0] ss:$8 sps:$4 sm:$0xff]  }
   0x7   :  { %118 = vmatprep.subr.bf16.mxu0 %v187_v0 }
   0x8   :  { %44 = vperm.xlu0 %174, %v36_v7  }
   0xa   :  { %119 = vmatpush1.bf16.msra.mxu0 %v177_v3 }
   0xb   :  { %120 = vmatprep.subr.bf16.mxu0 %v187_v0 }
   0xe   :  { %121 = vmatpush1.bf16.msra.mxu0 %v178_v4 }
   0xf   :  { %122 = vmatprep.subr.bf16.mxu0 %v187_v0 }
  0x12   :  { %123 = vmatpush1.bf16.msra.mxu0 %v179_v8 }
  0x13   :  { %124 = vmatprep.subr.bf16.mxu0 %v187_v0 }
  0x16   :  { %125 = vmatpush1.bf16.msra.mxu0 %v180_v9 }
  0x17   :  { %126 = vmatprep.subr.bf16.mxu0 %v187_v0 }
  0x1a   :  { %127 = vmatpush1.bf16.msra.mxu0 %v181_v10 }
  0x1b   :  { %128 = vmatprep.subr.bf16.mxu0 %v187_v0 }
  0x1e   :  { %129 = vmatpush1.bf16.msra.mxu0 %v182_v11 }
  0x1f   :  { %130 = vmatprep.subr.bf16.mxu0 %v187_v0 }
  0x22   :  { %131 = vmatpush1.bf16.msra.mxu0 %v183_v12 }
  0x25   :  { %147 = vmatmul.mubr.bf16.vlgmr.msra.gmra.mrb[0].mxu0 %v184_v13 }
  0x83   :  { %v40_v14 = vpop.permute.xlu0 %39 }
  0x87   :  { %v45_v18 = vpop.permute.xlu0 %44 }
  0xf8   :  { %v148_v15 = vpop.f32.mrb[0].mxu0 }
  0xf9   :  { %v149_v16 = vadd.f32 %v148_v15, %v40_v14  ;;  %v150_v17 = vpop.f32.mrb[1].mxu0 }
  0xfa   :  { %v151_v19 = vpop.f32.mrb[2].mxu0 }
  0xfb   :  { %155 = vst [vmem:[%s256_s3] sm:$0xff] %v149_v16  ;;  %v152_v20 = vadd.f32 %v151_v19, %v45_v18  ;;  %v153_v21 = vpop.f32.mrb[3].mxu0 }
  0xfd   :  { %156 = vst [vmem:[%s256_s3 + $0x8] sm:$0xff] %v152_v20 }

// kernel: net_forward.79
= control target key start
LH: loop header
LB: loop body
LE: loop exit
PB: predicated region body
PF: predicated region fallthrough
CT: control target
= control target key end

     0   :  { %v175_v0 = vmov 0   ;;  %vm104_vm0 = vcmask 130048   ;;  %s232_s1 = inlined_call_operand.vmem [shape: bf16[144,128], index: 1, kind: input, shape index: {}]   ;;  %s233_s0 = inlined_call_operand.vmem [shape: bf16[4,144], index: 0, kind: input, shape index: {}]   ;;  %s234_s2 = inlined_call_operand.vmem [shape: f32[4,1], index: 2, kind: input, shape index: {}]   ;;  %s235_s3 = inlined_call_operand.vmem [shape: f32[4,128], index: 3, kind: output, shape index: {}]  }
   0x1   :  { %108 = vmatprep.subr.bf16.mxu0 %v175_v0  ;;  %v166_v1 = vld [vmem:[%s232_s1] sm:$0xff]   ;;  %165 = vset.pattern.permute.xlu0 %v175_v0  ;;  %v167_v2 = vld [vmem:[%s232_s1 + $0x8] sm:$0xff]   ;;  %v168_v3 = vld [vmem:[%s232_s1 + $0x10] sm:$0xff]  }
   0x2   :  { %109 = vmatpush1.bf16.msra.mxu0 %v166_v1  ;;  %v153_v4 = vld.sshfl [vmem:[%s233_s0] sm:$0x33 pattern:$0x76325410]  ;;  %v169_v6 = vld [vmem:[%s232_s1 + $0x18] sm:$0xff]   ;;  %v171_v9 = vld [vmem:[%s232_s1 + $0x28] sm:$0xff]  }
   0x3   :  { %110 = vmatprep.subr.bf16.mxu0 %v175_v0  ;;  %v34_v5 = vld [vmem:[%s234_s2] sm:$0xf]  ;;  %v48_v7 = vcombine.high %v153_v4, %v153_v4  ;;  %v172_v10 = vld [vmem:[%s232_s1 + $0x30] sm:$0xff]   ;;  %v173_v11 = vld [vmem:[%s232_s1 + $0x38] sm:$0xff]  }
   0x4   :  { %37 = vperm.xlu0 %165, %v34_v5   ;;  %v170_v8 = vld [vmem:[%s232_s1 + $0x20] sm:$0xff]  }
   0x5   :  { %163 = vmatprep.mubr.msk.bf16.mxu0 %vm104_vm0, %v48_v7  ;;  %v174_v12 = vld [vmem:[%s232_s1 + $0x40] sm:$0xff]  }
   0x6   :  { %111 = vmatpush1.bf16.msra.mxu0 %v167_v2 }
   0x7   :  { %112 = vmatprep.subr.bf16.mxu0 %v175_v0 }
   0xa   :  { %113 = vmatpush1.bf16.msra.mxu0 %v168_v3 }
   0xb   :  { %114 = vmatprep.subr.bf16.mxu0 %v175_v0 }
   0xe   :  { %115 = vmatpush1.bf16.msra.mxu0 %v169_v6 }
   0xf   :  { %116 = vmatprep.subr.bf16.mxu0 %v175_v0 }
  0x12   :  { %117 = vmatpush1.bf16.msra.mxu0 %v170_v8 }
  0x13   :  { %118 = vmatprep.subr.bf16.mxu0 %v175_v0 }
  0x16   :  { %119 = vmatpush1.bf16.msra.mxu0 %v171_v9 }
  0x17   :  { %120 = vmatprep.subr.bf16.mxu0 %v175_v0 }
  0x1a   :  { %121 = vmatpush1.bf16.msra.mxu0 %v172_v10 }
  0x1b   :  { %122 = vmatprep.subr.bf16.mxu0 %v175_v0 }
  0x1e   :  { %123 = vmatpush1.bf16.msra.mxu0 %v173_v11 }
  0x1f   :  { %124 = vmatprep.subr.bf16.mxu0 %v175_v0 }
  0x22   :  { %125 = vmatpush1.bf16.msra.mxu0 %v174_v12 }
  0x25   :  { %141 = vmatmul.mubr.bf16.vlgmr.msra.gmra.mrb[0].mxu0 %v153_v4 }
  0x83   :  { %v38_v13 = vpop.permute.xlu0 %37 }
  0xf8   :  { %v142_v14 = vpop.f32.mrb[0].mxu0 }
  0xf9   :  { %v143_v15 = vadd.f32 %v142_v14, %v38_v13  ;;  %v144_v16 = vpop.f32.mrb[1].mxu0 }
  0xfa   :  { %v145_v17 = vpop.f32.mrb[2].mxu0 }
  0xfb   :  { %148 = vst [vmem:[%s235_s3] sm:$0xf] %v143_v15  ;;  %v146_v18 = vpop.f32.mrb[3].mxu0 }

</bundles_post_ra>
